<compile_context>
chip_gen: v7x
topology: tpu7x:2x2x1
jax: 0.10.0
libtpu: 0.0.40
codegen_flags: <defaults>
</compile_context>

<pallas_src>
import functools
import math

import jax
import jax.numpy as jnp
from jax.experimental import pallas as pl
from jax.experimental.pallas import tpu as pltpu


def _round_up(n, m):
    return ((n + m - 1) // m) * m


def _gelu_tanh(x):
    # tanh-approx GELU (avoids relying on erf lowering inside the kernel)
    c = math.sqrt(2.0 / math.pi)
    return 0.5 * x * (1.0 + jnp.tanh(c * (x + 0.044715 * x * x * x)))


def nfm_fc_kernel(x_ref, w1_ref, b1_ref, w2_ref, b2_ref, wc_ref,
                  y_ref, yf_ref, *, l_in, l_full_pad):
    # x_ref: (L_in, G*C) f32 -- time on sublanes, (batch-group, channel) on lanes.
    x = x_ref[...]

    # --- instance normalization over time (torch: dim=1, unbiased var, eps on var)
    x_mean = jnp.mean(x, axis=0, keepdims=True)                    # (1, G*C)
    xc = x - x_mean
    v = jnp.sum(xc * xc, axis=0, keepdims=True) * (1.0 / (l_in - 1)) + 1e-5
    inv_std = jax.lax.rsqrt(v)          # EUP slot, keeps VALU free
    x_std = v * inv_std                 # sqrt(v) == v * rsqrt(v): one VPU mul
    xn = xc * inv_std                                              # (L_in, G*C)

    # --- NFM backbone stand-in: residual GELU channel-MLP, block-diag weights.
    # TODO(synk): NFM_general internals are not given in the reference file;
    # substituted with a residual GELU MLP over the channel dimension.
    # Operands bf16 for the MXU, accumulation f32, elementwise math f32.
    h = _gelu_tanh(
        jnp.dot(xn.astype(jnp.bfloat16), w1_ref[...],
                preferred_element_type=jnp.float32) + b1_ref[...])  # (L_in, G*H)
    z = (jnp.dot(h.astype(jnp.bfloat16), w2_ref[...],
                 preferred_element_type=jnp.float32)
         + b2_ref[...] + xn)                                        # (L_in, G*C)

    # --- Fused forecasting head + rFFT + de-normalization: ONE MXU push.
    # TODO(synk): Forecasting_head internals are not given; using a time-axis
    # linear projection (its standard form), prefolded with the DFT in wrapper.
    #   z_aug = [z ; 1 ; mean*inv_std],  wc = [[wp|bp|1] ; [F@wp|F@bp|F@1]]
    #   (wc @ z_aug) * x_std == [y_denorm ; stacked rfft(y_denorm)]
    ones_row = jnp.ones_like(x_mean)
    z_aug = jnp.concatenate([z, ones_row, x_mean * inv_std], axis=0)  # (L_in+2, G*C)
    out = jnp.dot(wc_ref[...], z_aug,
                  preferred_element_type=jnp.float32) * x_std      # (Rp1+Rp2, G*C)

    # Row split at a sublane-aligned (multiple-of-8) boundary: no relayout.
    y_ref[...] = out[:l_full_pad].astype(y_ref.dtype)
    yf_ref[...] = out[l_full_pad:].astype(yf_ref.dtype)


def nfm_fc_forward(x, params, L_out, *, batch_group=None):
    """x: (B, L_in, C) float32. Returns (y, y_freq, x_horizon)."""
    B, L_in, C = x.shape
    w1, b1, w2, b2, wp, bp, fr, fi = params
    H = w1.shape[1]
    L_full = wp.shape[0]
    Fk = fr.shape[0]
    Fk2 = 2 * Fk

    # --- batch group: G batch elements per grid step, lane width G*C % 128 == 0
    G = math.lcm(C, 128) // C if batch_group is None else batch_group
    lanes = G * C
    assert lanes % 128 == 0, "lane tile (G*C) must be a multiple of 128"
    B_pad = _round_up(B, G)
    steps = B_pad // G   # >1 for real batch sizes -> pipelining + v7x 2-TC split

    # --- lane-dense layout: fold (batch, channel) into the lane axis.
    # TODO(synk): in a real model keep the (time, batch*channel) layout and the
    # derived weights below cached across calls; rebuilt here for self-containment.
    xp = jnp.pad(x, ((0, B_pad - B), (0, 0), (0, 0)))
    x2 = jnp.transpose(xp, (1, 0, 2)).reshape(L_in, B_pad * C)     # (L_in, B_pad*C)

    # --- fixed-size block-diagonal MLP weights, built directly in bf16 ---
    eye = jnp.eye(G, dtype=jnp.bfloat16)
    w1b = jnp.kron(eye, w1.astype(jnp.bfloat16))                   # (G*C, G*H)
    w2b = jnp.kron(eye, w2.astype(jnp.bfloat16))                   # (G*H, G*C)
    b1b = jnp.tile(b1, (1, G))                                     # (1, G*H) f32
    b2b = jnp.tile(b2, (1, G))                                     # (1, G*C) f32

    # --- fused head + rFFT weight, row-padded to full sublane tiles ---
    Rp1 = _round_up(L_full, 8)
    Rp2 = _round_up(Fk2, 8)
    fdft = jnp.concatenate([fr, fi], axis=0)                       # (2Fk, L_full)
    ones_col = jnp.ones((L_full, 1), jnp.float32)
    top = jnp.concatenate([wp, bp, ones_col], axis=1)              # (L_full, L_in+2)
    bot = jnp.concatenate([fdft @ wp, fdft @ bp, fdft @ ones_col], axis=1)
    wc = jnp.concatenate([
        jnp.pad(top, ((0, Rp1 - L_full), (0, 0))),
        jnp.pad(bot, ((0, Rp2 - Fk2), (0, 0))),
    ], axis=0)                                                     # (Rp1+Rp2, L_in+2)

    def const_spec(shape, single_buffer):
        # Grid-invariant operands: single-buffer when supported to save VMEM.
        if single_buffer:
            return pl.BlockSpec(shape, lambda i: (0, 0),
                                pipeline_mode=pl.Buffered(1))
        return pl.BlockSpec(shape, lambda i: (0, 0))

    def build(single_buffer_weights):
        kernel = functools.partial(nfm_fc_kernel, l_in=L_in, l_full_pad=Rp1)
        flops = int(steps * 2 * (2 * L_in * lanes * G * H
                                 + (Rp1 + Rp2) * (L_in + 2) * lanes))
        trans = int(steps * (L_in * G * H + lanes))
        bytes_acc = int(4 * (x2.size + (Rp1 + Rp2) * B_pad * C
                             + wc.size + b1b.size + b2b.size)
                        + 2 * (w1b.size + w2b.size))
        # Per-step VMEM footprint (x/outputs double-buffered, weights 1x or 2x);
        # cap at 48 MiB so the same code fits v7x's 64 MiB VMEM.  On v6e one can
        # raise G (bigger lane tiles) and let this grow toward 96 MiB.
        wbuf = (1 if single_buffer_weights else 2)
        need = (2 * 4 * L_in * lanes
                + wbuf * (2 * (w1b.size + w2b.size)
                          + 4 * (wc.size + b1b.size + b2b.size))
                + 2 * 4 * (Rp1 + Rp2) * lanes)
        vmem_limit = int(min(max(4 * need, 16 * 1024 * 1024), 48 * 1024 * 1024))
        return pl.pallas_call(
            kernel,
            out_shape=(
                jax.ShapeDtypeStruct((Rp1, B_pad * C), jnp.float32),
                jax.ShapeDtypeStruct((Rp2, B_pad * C), jnp.float32),
            ),
            grid=(steps,),
            in_specs=[
                pl.BlockSpec((L_in, lanes), lambda i: (0, i)),     # x (streams)
                const_spec((lanes, G * H), single_buffer_weights),  # kron(I,w1) bf16
                const_spec((1, G * H), single_buffer_weights),      # b1 tiled
                const_spec((G * H, lanes), single_buffer_weights),  # kron(I,w2) bf16
                const_spec((1, lanes), single_buffer_weights),      # b2 tiled
                const_spec((Rp1 + Rp2, L_in + 2), single_buffer_weights),  # fused head+DFT
            ],
            out_specs=(
                pl.BlockSpec((Rp1, lanes), lambda i: (0, i)),      # y (time x lanes)
                pl.BlockSpec((Rp2, lanes), lambda i: (0, i)),      # stacked re/im
            ),
            compiler_params=pltpu.CompilerParams(
                dimension_semantics=("parallel",),
                vmem_limit_bytes=vmem_limit),
            cost_estimate=pl.CostEstimate(
                flops=flops, transcendentals=trans, bytes_accessed=bytes_acc),
        )

    args = (x2, w1b, b1b, w2b, b2b, wc)
    try:
        y2, yf2 = build(True)(*args)
    except Exception:
        # This JAX build rejects pl.Buffered(1); default double-buffering is
        # fine here (weights are <1 MiB at the fixed group size).
        y2, yf2 = build(False)(*args)

    # unfold lanes back to (batch, channel); drop batch and row padding
    y = jnp.transpose(y2.reshape(Rp1, B_pad, C), (1, 0, 2))[:B, :L_full]   # (B,L_full,C)
    yf = jnp.transpose(yf2.reshape(Rp2, B_pad, C), (1, 0, 2))[:B, :Fk2]    # (B,2Fk,C)
    y_freq = jax.lax.complex(yf[:, :Fk, :], yf[:, Fk:, :])                 # (B,Fk,C)
    x_horizon = y[:, -L_out:, :]
    return y, y_freq, x_horizon


def init_params(key, L_in, L_out, C, H):
    L_full = L_in + L_out
    k1, k2, k3, k4, k5, k6 = jax.random.split(key, 6)
    w1 = jax.random.normal(k1, (C, H), jnp.float32) * (1.0 / math.sqrt(C))
    b1 = jax.random.normal(k2, (1, H), jnp.float32) * 0.01
    w2 = jax.random.normal(k3, (H, C), jnp.float32) * (1.0 / math.sqrt(H))
    b2 = jax.random.normal(k4, (1, C), jnp.float32) * 0.01
    wp = jax.random.normal(k5, (L_full, L_in), jnp.float32) * (1.0 / math.sqrt(L_in))
    bp = jax.random.normal(k6, (L_full, 1), jnp.float32) * 0.01

    # real-FFT DFT matrices over the time axis of the full output (length L_full)
    Fk = L_full // 2 + 1
    n = jnp.arange(L_full, dtype=jnp.float32)
    k = jnp.arange(Fk, dtype=jnp.float32)
    angle = -2.0 * math.pi * k[:, None] * n[None, :] / L_full
    fr = jnp.cos(angle)
    fi = jnp.sin(angle)
    return (w1, b1, w2, b2, wp, bp, fr, fi)


if __name__ == "__main__":
    B, L_in, C = 2, 16, 4
    L_out, H = 8, 32

    key = jax.random.PRNGKey(0)
    kx, kp = jax.random.split(key)
    x = jax.random.normal(kx, (B, L_in, C), jnp.float32)
    params = init_params(kp, L_in, L_out, C, H)

    y, y_freq, x_horizon = nfm_fc_forward(x, params, L_out)
    jax.block_until_ready((y, y_freq, x_horizon))

    assert y.shape == (B, L_in + L_out, C)
    assert y_freq.shape == (B, (L_in + L_out) // 2 + 1, C)
    assert x_horizon.shape == (B, L_out, C)
    assert bool(jnp.all(jnp.isfinite(y)))
    assert bool(jnp.all(jnp.isfinite(y_freq.real))) and bool(jnp.all(jnp.isfinite(y_freq.imag)))
    print("KERNEL_OK")
</pallas_src>

<mosaic_0001>
module attributes {stable_mosaic.version = 11 : i64} {
  func.func @nfm_fc_kernel(%arg0: i32, %arg1: memref<16x128xf32, #tpu.memory_space<vmem>>, %arg2: memref<128x1024xbf16, #tpu.memory_space<vmem>>, %arg3: memref<1x1024xf32, #tpu.memory_space<vmem>>, %arg4: memref<1024x128xbf16, #tpu.memory_space<vmem>>, %arg5: memref<1x128xf32, #tpu.memory_space<vmem>>, %arg6: memref<56x18xf32, #tpu.memory_space<vmem>>, %arg7: memref<24x128xf32, #tpu.memory_space<vmem>>, %arg8: memref<32x128xf32, #tpu.memory_space<vmem>>) attributes {dimension_semantics = [#tpu.dimension_semantics<parallel>], iteration_bounds = array<i64: 1>, scalar_prefetch = 0 : i64, scratch_operands = 0 : i64, tpu.core_type = #tpu.core_type<tc>, window_params = [{transform_indices = @transform_0, window_bounds = array<i64: 16, 128>}, {pipeline_mode = #tpu.pipeline_mode<synchronous>, transform_indices = @transform_1, window_bounds = array<i64: 128, 1024>}, {pipeline_mode = #tpu.pipeline_mode<synchronous>, transform_indices = @transform_2, window_bounds = array<i64: 1, 1024>}, {pipeline_mode = #tpu.pipeline_mode<synchronous>, transform_indices = @transform_3, window_bounds = array<i64: 1024, 128>}, {pipeline_mode = #tpu.pipeline_mode<synchronous>, transform_indices = @transform_4, window_bounds = array<i64: 1, 128>}, {pipeline_mode = #tpu.pipeline_mode<synchronous>, transform_indices = @transform_5, window_bounds = array<i64: 56, 18>}, {transform_indices = @transform_6, window_bounds = array<i64: 24, 128>}, {transform_indices = @transform_7, window_bounds = array<i64: 32, 128>}]} {
    %c0 = arith.constant 0 : index
    %c0_0 = arith.constant 0 : index
    %0 = vector.load %arg1[%c0, %c0_0] : memref<16x128xf32, #tpu.memory_space<vmem>>, vector<16x128xf32>
    %cst = arith.constant dense<0.000000e+00> : vector<128xf32>
    %1 = vector.multi_reduction <add>, %0, %cst [0] : vector<16x128xf32> to vector<128xf32>
    %2 = vector.shape_cast %1 : vector<128xf32> to vector<1x128xf32>
    %cst_1 = arith.constant 1.600000e+01 : f32
    %3 = vector.broadcast %cst_1 : f32 to vector<1x128xf32>
    %4 = arith.divf %2, %3 : vector<1x128xf32>
    %5 = vector.broadcast %4 : vector<1x128xf32> to vector<16x128xf32>
    %6 = arith.subf %0, %5 : vector<16x128xf32>
    %7 = arith.mulf %6, %6 : vector<16x128xf32>
    %cst_2 = arith.constant dense<0.000000e+00> : vector<128xf32>
    %8 = vector.multi_reduction <add>, %7, %cst_2 [0] : vector<16x128xf32> to vector<128xf32>
    %9 = vector.shape_cast %8 : vector<128xf32> to vector<1x128xf32>
    %cst_3 = arith.constant 0.0666666701 : f32
    %10 = vector.broadcast %cst_3 : f32 to vector<1x128xf32>
    %11 = arith.mulf %9, %10 : vector<1x128xf32>
    %cst_4 = arith.constant 9.99999974E-6 : f32
    %12 = vector.broadcast %cst_4 : f32 to vector<1x128xf32>
    %13 = arith.addf %11, %12 : vector<1x128xf32>
    %14 = math.rsqrt %13 : vector<1x128xf32>
    %15 = arith.mulf %13, %14 : vector<1x128xf32>
    %16 = vector.broadcast %14 : vector<1x128xf32> to vector<16x128xf32>
    %17 = arith.mulf %6, %16 : vector<16x128xf32>
    %18 = arith.truncf %17 : vector<16x128xf32> to vector<16x128xbf16>
    %c0_5 = arith.constant 0 : index
    %c0_6 = arith.constant 0 : index
    %19 = vector.load %arg2[%c0_5, %c0_6] : memref<128x1024xbf16, #tpu.memory_space<vmem>>, vector<128x1024xbf16>
    %cst_7 = arith.constant dense<0.000000e+00> : vector<16x1024xf32>
    %20 = tpu.matmul %18, %19, %cst_7 {dimension_numbers = #tpu.dot_dimension_numbers<[1], [0], [0], [1], [0, 0, 1, 1], [], []>} : vector<16x128xbf16>, vector<128x1024xbf16>, vector<16x1024xf32> -> vector<16x1024xf32>
    %c0_8 = arith.constant 0 : index
    %c0_9 = arith.constant 0 : index
    %21 = vector.load %arg3[%c0_8, %c0_9] : memref<1x1024xf32, #tpu.memory_space<vmem>>, vector<1x1024xf32>
    %22 = vector.broadcast %21 : vector<1x1024xf32> to vector<16x1024xf32>
    %23 = arith.addf %20, %22 : vector<16x1024xf32>
    %cst_10 = arith.constant 5.000000e-01 : f32
    %24 = vector.broadcast %cst_10 : f32 to vector<16x1024xf32>
    %25 = arith.mulf %24, %23 : vector<16x1024xf32>
    %cst_11 = arith.constant 4.471500e-02 : f32
    %26 = vector.broadcast %cst_11 : f32 to vector<16x1024xf32>
    %27 = arith.mulf %26, %23 : vector<16x1024xf32>
    %28 = arith.mulf %27, %23 : vector<16x1024xf32>
    %29 = arith.mulf %28, %23 : vector<16x1024xf32>
    %30 = arith.addf %23, %29 : vector<16x1024xf32>
    %cst_12 = arith.constant 0.797884583 : f32
    %31 = vector.broadcast %cst_12 : f32 to vector<16x1024xf32>
    %32 = arith.mulf %31, %30 : vector<16x1024xf32>
    %33 = math.tanh %32 : vector<16x1024xf32>
    %cst_13 = arith.constant 1.000000e+00 : f32
    %34 = vector.broadcast %cst_13 : f32 to vector<16x1024xf32>
    %35 = arith.addf %34, %33 : vector<16x1024xf32>
    %36 = arith.mulf %25, %35 : vector<16x1024xf32>
    %37 = arith.truncf %36 : vector<16x1024xf32> to vector<16x1024xbf16>
    %c0_14 = arith.constant 0 : index
    %c0_15 = arith.constant 0 : index
    %38 = vector.load %arg4[%c0_14, %c0_15] : memref<1024x128xbf16, #tpu.memory_space<vmem>>, vector<1024x128xbf16>
    %cst_16 = arith.constant dense<0.000000e+00> : vector<16x128xf32>
    %39 = tpu.matmul %37, %38, %cst_16 {dimension_numbers = #tpu.dot_dimension_numbers<[1], [0], [0], [1], [0, 0, 1, 1], [], []>} : vector<16x1024xbf16>, vector<1024x128xbf16>, vector<16x128xf32> -> vector<16x128xf32>
    %c0_17 = arith.constant 0 : index
    %c0_18 = arith.constant 0 : index
    %40 = vector.load %arg5[%c0_17, %c0_18] : memref<1x128xf32, #tpu.memory_space<vmem>>, vector<1x128xf32>
    %41 = vector.broadcast %40 : vector<1x128xf32> to vector<16x128xf32>
    %42 = arith.addf %39, %41 : vector<16x128xf32>
    %43 = arith.addf %42, %17 : vector<16x128xf32>
    %cst_19 = arith.constant 1.000000e+00 : f32
    %44 = vector.broadcast %cst_19 : f32 to vector<1x128xf32>
    %45 = arith.mulf %4, %14 : vector<1x128xf32>
    %46 = tpu.concatenate %43, %44, %45 in 0 : vector<16x128xf32>, vector<1x128xf32>, vector<1x128xf32> -> vector<18x128xf32>
    %c0_20 = arith.constant 0 : index
    %c0_21 = arith.constant 0 : index
    %47 = vector.load %arg6[%c0_20, %c0_21] : memref<56x18xf32, #tpu.memory_space<vmem>>, vector<56x18xf32>
    %cst_22 = arith.constant dense<0.000000e+00> : vector<56x128xf32>
    %48 = tpu.matmul %47, %46, %cst_22 {dimension_numbers = #tpu.dot_dimension_numbers<[1], [0], [0], [1], [0, 0, 1, 1], [], []>} : vector<56x18xf32>, vector<18x128xf32>, vector<56x128xf32> -> vector<56x128xf32>
    %49 = vector.broadcast %15 : vector<1x128xf32> to vector<56x128xf32>
    %50 = arith.mulf %48, %49 : vector<56x128xf32>
    %51 = vector.extract_strided_slice %50 {offsets = [0, 0], sizes = [24, 128], strides = [1, 1]} : vector<56x128xf32> to vector<24x128xf32>
    %c0_23 = arith.constant 0 : index
    %c0_24 = arith.constant 0 : index
    %52 = vector.load %arg7[%c0_23, %c0_24] : memref<24x128xf32, #tpu.memory_space<vmem>>, vector<24x128xf32>
    tpu.vector_store %arg7[%c0_23, %c0_24], %51 {strides = array<i32>} : memref<24x128xf32, #tpu.memory_space<vmem>>, vector<24x128xf32>,
    %53 = vector.extract_strided_slice %50 {offsets = [24, 0], sizes = [32, 128], strides = [1, 1]} : vector<56x128xf32> to vector<32x128xf32>
    %c0_25 = arith.constant 0 : index
    %c0_26 = arith.constant 0 : index
    %54 = vector.load %arg8[%c0_25, %c0_26] : memref<32x128xf32, #tpu.memory_space<vmem>>, vector<32x128xf32>
    tpu.vector_store %arg8[%c0_25, %c0_26], %53 {strides = array<i32>} : memref<32x128xf32, #tpu.memory_space<vmem>>, vector<32x128xf32>,
    return
  }
  func.func @transform_0(%arg0: i32) -> (i32, i32) {
    %c0_i32 = arith.constant 0 : i32
    %c0_i32_0 = arith.constant 0 : i32
    return %c0_i32, %arg0 : i32, i32
  }
  func.func @transform_1(%arg0: i32) -> (i32, i32) {
    %c0_i32 = arith.constant 0 : i32
    %c0_i32_0 = arith.constant 0 : i32
    %c0_i32_1 = arith.constant 0 : i32
    return %c0_i32, %c0_i32_0 : i32, i32
  }
  func.func @transform_2(%arg0: i32) -> (i32, i32) {
    %c0_i32 = arith.constant 0 : i32
    %c0_i32_0 = arith.constant 0 : i32
    %c0_i32_1 = arith.constant 0 : i32
    return %c0_i32, %c0_i32_0 : i32, i32
  }
  func.func @transform_3(%arg0: i32) -> (i32, i32) {
    %c0_i32 = arith.constant 0 : i32
    %c0_i32_0 = arith.constant 0 : i32
    %c0_i32_1 = arith.constant 0 : i32
    return %c0_i32, %c0_i32_0 : i32, i32
  }
  func.func @transform_4(%arg0: i32) -> (i32, i32) {
    %c0_i32 = arith.constant 0 : i32
    %c0_i32_0 = arith.constant 0 : i32
    %c0_i32_1 = arith.constant 0 : i32
    return %c0_i32, %c0_i32_0 : i32, i32
  }
  func.func @transform_5(%arg0: i32) -> (i32, i32) {
    %c0_i32 = arith.constant 0 : i32
    %c0_i32_0 = arith.constant 0 : i32
    %c0_i32_1 = arith.constant 0 : i32
    return %c0_i32, %c0_i32_0 : i32, i32
  }
  func.func @transform_6(%arg0: i32) -> (i32, i32) {
    %c0_i32 = arith.constant 0 : i32
    %c0_i32_0 = arith.constant 0 : i32
    return %c0_i32, %arg0 : i32, i32
  }
  func.func @transform_7(%arg0: i32) -> (i32, i32) {
    %c0_i32 = arith.constant 0 : i32
    %c0_i32_0 = arith.constant 0 : i32
    return %c0_i32, %arg0 : i32, i32
  }
}

module attributes {stable_mosaic.version = 11 : i64} {
  func.func @nfm_fc_kernel(%arg0: i32, %arg1: memref<16x128xf32, #tpu.memory_space<vmem>>, %arg2: memref<128x1024xbf16, #tpu.memory_space<vmem>>, %arg3: memref<1x1024xf32, #tpu.memory_space<vmem>>, %arg4: memref<1024x128xbf16, #tpu.memory_space<vmem>>, %arg5: memref<1x128xf32, #tpu.memory_space<vmem>>, %arg6: memref<56x18xf32, #tpu.memory_space<vmem>>, %arg7: memref<24x128xf32, #tpu.memory_space<vmem>>, %arg8: memref<32x128xf32, #tpu.memory_space<vmem>>) attributes {dimension_semantics = [#tpu.dimension_semantics<parallel>], iteration_bounds = array<i64: 1>, scalar_prefetch = 0 : i64, scratch_operands = 0 : i64, tpu.core_type = #tpu.core_type<tc>, window_params = [{transform_indices = @transform_0, window_bounds = array<i64: 16, 128>}, {pipeline_mode = #tpu.pipeline_mode<synchronous>, transform_indices = @transform_1, window_bounds = array<i64: 128, 1024>}, {pipeline_mode = #tpu.pipeline_mode<synchronous>, transform_indices = @transform_2, window_bounds = array<i64: 1, 1024>}, {pipeline_mode = #tpu.pipeline_mode<synchronous>, transform_indices = @transform_3, window_bounds = array<i64: 1024, 128>}, {pipeline_mode = #tpu.pipeline_mode<synchronous>, transform_indices = @transform_4, window_bounds = array<i64: 1, 128>}, {pipeline_mode = #tpu.pipeline_mode<synchronous>, transform_indices = @transform_5, window_bounds = array<i64: 56, 18>}, {transform_indices = @transform_6, window_bounds = array<i64: 24, 128>}, {transform_indices = @transform_7, window_bounds = array<i64: 32, 128>}]} {
    %c0 = arith.constant 0 : index
    %c0_0 = arith.constant 0 : index
    %0 = vector.load %arg1[%c0, %c0_0] : memref<16x128xf32, #tpu.memory_space<vmem>>, vector<16x128xf32>
    %cst = arith.constant dense<0.000000e+00> : vector<128xf32>
    %1 = vector.multi_reduction <add>, %0, %cst [0] : vector<16x128xf32> to vector<128xf32>
    %2 = vector.shape_cast %1 : vector<128xf32> to vector<1x128xf32>
    %cst_1 = arith.constant 1.600000e+01 : f32
    %3 = vector.broadcast %cst_1 : f32 to vector<1x128xf32>
    %4 = arith.divf %2, %3 : vector<1x128xf32>
    %5 = vector.broadcast %4 : vector<1x128xf32> to vector<16x128xf32>
    %6 = arith.subf %0, %5 : vector<16x128xf32>
    %7 = arith.mulf %6, %6 : vector<16x128xf32>
    %cst_2 = arith.constant dense<0.000000e+00> : vector<128xf32>
    %8 = vector.multi_reduction <add>, %7, %cst_2 [0] : vector<16x128xf32> to vector<128xf32>
    %9 = vector.shape_cast %8 : vector<128xf32> to vector<1x128xf32>
    %cst_3 = arith.constant 0.0666666701 : f32
    %10 = vector.broadcast %cst_3 : f32 to vector<1x128xf32>
    %11 = arith.mulf %9, %10 : vector<1x128xf32>
    %cst_4 = arith.constant 9.99999974E-6 : f32
    %12 = vector.broadcast %cst_4 : f32 to vector<1x128xf32>
    %13 = arith.addf %11, %12 : vector<1x128xf32>
    %14 = math.rsqrt %13 : vector<1x128xf32>
    %15 = arith.mulf %13, %14 : vector<1x128xf32>
    %16 = vector.broadcast %14 : vector<1x128xf32> to vector<16x128xf32>
    %17 = arith.mulf %6, %16 : vector<16x128xf32>
    %18 = arith.truncf %17 : vector<16x128xf32> to vector<16x128xbf16>
    %c0_5 = arith.constant 0 : index
    %c0_6 = arith.constant 0 : index
    %19 = vector.load %arg2[%c0_5, %c0_6] : memref<128x1024xbf16, #tpu.memory_space<vmem>>, vector<128x1024xbf16>
    %cst_7 = arith.constant dense<0.000000e+00> : vector<16x1024xf32>
    %20 = tpu.matmul %18, %19, %cst_7 {dimension_numbers = #tpu.dot_dimension_numbers<[1], [0], [0], [1], [0, 0, 1, 1], [], []>} : vector<16x128xbf16>, vector<128x1024xbf16>, vector<16x1024xf32> -> vector<16x1024xf32>
    %c0_8 = arith.constant 0 : index
    %c0_9 = arith.constant 0 : index
    %21 = vector.load %arg3[%c0_8, %c0_9] : memref<1x1024xf32, #tpu.memory_space<vmem>>, vector<1x1024xf32>
    %22 = vector.broadcast %21 : vector<1x1024xf32> to vector<16x1024xf32>
    %23 = arith.addf %20, %22 : vector<16x1024xf32>
    %cst_10 = arith.constant 5.000000e-01 : f32
    %24 = vector.broadcast %cst_10 : f32 to vector<16x1024xf32>
    %25 = arith.mulf %24, %23 : vector<16x1024xf32>
    %cst_11 = arith.constant 4.471500e-02 : f32
    %26 = vector.broadcast %cst_11 : f32 to vector<16x1024xf32>
    %27 = arith.mulf %26, %23 : vector<16x1024xf32>
    %28 = arith.mulf %27, %23 : vector<16x1024xf32>
    %29 = arith.mulf %28, %23 : vector<16x1024xf32>
    %30 = arith.addf %23, %29 : vector<16x1024xf32>
    %cst_12 = arith.constant 0.797884583 : f32
    %31 = vector.broadcast %cst_12 : f32 to vector<16x1024xf32>
    %32 = arith.mulf %31, %30 : vector<16x1024xf32>
    %33 = math.tanh %32 : vector<16x1024xf32>
    %cst_13 = arith.constant 1.000000e+00 : f32
    %34 = vector.broadcast %cst_13 : f32 to vector<16x1024xf32>
    %35 = arith.addf %34, %33 : vector<16x1024xf32>
    %36 = arith.mulf %25, %35 : vector<16x1024xf32>
    %37 = arith.truncf %36 : vector<16x1024xf32> to vector<16x1024xbf16>
    %c0_14 = arith.constant 0 : index
    %c0_15 = arith.constant 0 : index
    %38 = vector.load %arg4[%c0_14, %c0_15] : memref<1024x128xbf16, #tpu.memory_space<vmem>>, vector<1024x128xbf16>
    %cst_16 = arith.constant dense<0.000000e+00> : vector<16x128xf32>
    %39 = tpu.matmul %37, %38, %cst_16 {dimension_numbers = #tpu.dot_dimension_numbers<[1], [0], [0], [1], [0, 0, 1, 1], [], []>} : vector<16x1024xbf16>, vector<1024x128xbf16>, vector<16x128xf32> -> vector<16x128xf32>
    %c0_17 = arith.constant 0 : index
    %c0_18 = arith.constant 0 : index
    %40 = vector.load %arg5[%c0_17, %c0_18] : memref<1x128xf32, #tpu.memory_space<vmem>>, vector<1x128xf32>
    %41 = vector.broadcast %40 : vector<1x128xf32> to vector<16x128xf32>
    %42 = arith.addf %39, %41 : vector<16x128xf32>
    %43 = arith.addf %42, %17 : vector<16x128xf32>
    %cst_19 = arith.constant 1.000000e+00 : f32
    %44 = vector.broadcast %cst_19 : f32 to vector<1x128xf32>
    %45 = arith.mulf %4, %14 : vector<1x128xf32>
    %46 = tpu.concatenate %43, %44, %45 in 0 : vector<16x128xf32>, vector<1x128xf32>, vector<1x128xf32> -> vector<18x128xf32>
    %c0_20 = arith.constant 0 : index
    %c0_21 = arith.constant 0 : index
    %47 = vector.load %arg6[%c0_20, %c0_21] : memref<56x18xf32, #tpu.memory_space<vmem>>, vector<56x18xf32>
    %cst_22 = arith.constant dense<0.000000e+00> : vector<56x128xf32>
    %48 = tpu.matmul %47, %46, %cst_22 {dimension_numbers = #tpu.dot_dimension_numbers<[1], [0], [0], [1], [0, 0, 1, 1], [], []>} : vector<56x18xf32>, vector<18x128xf32>, vector<56x128xf32> -> vector<56x128xf32>
    %49 = vector.broadcast %15 : vector<1x128xf32> to vector<56x128xf32>
    %50 = arith.mulf %48, %49 : vector<56x128xf32>
    %51 = vector.extract_strided_slice %50 {offsets = [0, 0], sizes = [24, 128], strides = [1, 1]} : vector<56x128xf32> to vector<24x128xf32>
    %c0_23 = arith.constant 0 : index
    %c0_24 = arith.constant 0 : index
    %52 = vector.load %arg7[%c0_23, %c0_24] : memref<24x128xf32, #tpu.memory_space<vmem>>, vector<24x128xf32>
    tpu.vector_store %arg7[%c0_23, %c0_24], %51 {strides = array<i32>} : memref<24x128xf32, #tpu.memory_space<vmem>>, vector<24x128xf32>,
    %53 = vector.extract_strided_slice %50 {offsets = [24, 0], sizes = [32, 128], strides = [1, 1]} : vector<56x128xf32> to vector<32x128xf32>
    %c0_25 = arith.constant 0 : index
    %c0_26 = arith.constant 0 : index
    %54 = vector.load %arg8[%c0_25, %c0_26] : memref<32x128xf32, #tpu.memory_space<vmem>>, vector<32x128xf32>
    tpu.vector_store %arg8[%c0_25, %c0_26], %53 {strides = array<i32>} : memref<32x128xf32, #tpu.memory_space<vmem>>, vector<32x128xf32>,
    return
  }
  func.func @transform_0(%arg0: i32) -> (i32, i32) {
    %c0_i32 = arith.constant 0 : i32
    %c0_i32_0 = arith.constant 0 : i32
    return %c0_i32, %arg0 : i32, i32
  }
  func.func @transform_1(%arg0: i32) -> (i32, i32) {
    %c0_i32 = arith.constant 0 : i32
    %c0_i32_0 = arith.constant 0 : i32
    %c0_i32_1 = arith.constant 0 : i32
    return %c0_i32, %c0_i32_0 : i32, i32
  }
  func.func @transform_2(%arg0: i32) -> (i32, i32) {
    %c0_i32 = arith.constant 0 : i32
    %c0_i32_0 = arith.constant 0 : i32
    %c0_i32_1 = arith.constant 0 : i32
    return %c0_i32, %c0_i32_0 : i32, i32
  }
  func.func @transform_3(%arg0: i32) -> (i32, i32) {
    %c0_i32 = arith.constant 0 : i32
    %c0_i32_0 = arith.constant 0 : i32
    %c0_i32_1 = arith.constant 0 : i32
    return %c0_i32, %c0_i32_0 : i32, i32
  }
  func.func @transform_4(%arg0: i32) -> (i32, i32) {
    %c0_i32 = arith.constant 0 : i32
    %c0_i32_0 = arith.constant 0 : i32
    %c0_i32_1 = arith.constant 0 : i32
    return %c0_i32, %c0_i32_0 : i32, i32
  }
  func.func @transform_5(%arg0: i32) -> (i32, i32) {
    %c0_i32 = arith.constant 0 : i32
    %c0_i32_0 = arith.constant 0 : i32
    %c0_i32_1 = arith.constant 0 : i32
    return %c0_i32, %c0_i32_0 : i32, i32
  }
  func.func @transform_6(%arg0: i32) -> (i32, i32) {
    %c0_i32 = arith.constant 0 : i32
    %c0_i32_0 = arith.constant 0 : i32
    return %c0_i32, %arg0 : i32, i32
  }
  func.func @transform_7(%arg0: i32) -> (i32, i32) {
    %c0_i32 = arith.constant 0 : i32
    %c0_i32_0 = arith.constant 0 : i32
    return %c0_i32, %arg0 : i32, i32
  }
}

</mosaic_0001>

<bundles_post_ra>
// kernel: tpu_custom_call.1
= control target key start
LH: loop header
LB: loop body
LE: loop exit
PB: predicated region body
PF: predicated region fallthrough
CT: control target
= control target key end

     0   :  { %13 = vsyncpa [#allocation3], 0  ;;  %s2504_s0 = inlined_call_operand.vmem [shape: f32[16,128], index: 0, kind: input, shape index: {}]   ;;  %s2505_s1 = inlined_call_operand.hbm [shape: bf16[128,1024], index: 1, kind: input, shape index: {}]   ;;  %s2506_s2 = inlined_call_operand.vmem [shape: f32[1,1024], index: 2, kind: input, shape index: {}]   ;;  %s2507_s3 = inlined_call_operand.hbm [shape: bf16[1024,128], index: 3, kind: input, shape index: {}]   ;;  %s2508_s4 = inlined_call_operand.vmem [shape: f32[1,128], index: 4, kind: input, shape index: {}]   ;;  %s2509_s5 = inlined_call_operand.vmem [shape: f32[56,18], index: 5, kind: input, shape index: {}]   ;;  %s2510_s6 = inlined_call_operand.hbm [shape: f32[24,128], index: 6, kind: output, shape index: {0}]   ;;  %s2511_s7 = inlined_call_operand.hbm [shape: f32[32,128], index: 7, kind: output, shape index: {1}]  }
   0x1   :  { %14 = vsyncpa [#allocation6], 0 }
   0x2   :  { %15 = vsyncpa [#allocation4], 0 }
   0x3   :  { %16 = vsyncpa [#allocation9], 0  ;;  %s2181_s24 = smov [#allocation2]   ;;  %s2085_s28 = scalar_lea.hbm %s2505_s1, 8192 }
   0x4   :  { %s24_s25 = sshll.u32 %s2181_s24, 4  ;;  %p2086_p0 = scmp.ne.s32.totalorder %s2505_s1, %s2085_s28  ;;  %s25_s25 = int_to_ptr.vmem [resolvable:$true] %s24_s25 }
   0x5   :  { %p2089_p1 = scmp.lt.u32.totalorder %s2085_s28, %s2505_s1 }
   0x7   :  { %p2091_p2 = pnand %p2089_p1, %p2086_p0 }
   0x9   :  { %2094 = shalt.err (!%p2091_p2)
}
   0xa   :  { %s2095_s10 = scalar_lea.vmem %s25_s25, 8192  ;;  %p2100_p4 = scmp.lt.s32.totalorder %s25_s25, %s25_s25 }
   0xb   :  { %p2096_p3 = scmp.ne.s32.totalorder %s25_s25, %s2095_s10  ;;  %p2101_p5 = scmp.lt.s32.totalorder %s2095_s10, %s2095_s10 }
   0xd   :  { %p2102_p6 = por %p2101_p5, %p2100_p4 }
   0xf   :  { %p2103_p7 = pnand %p2102_p6, %p2096_p3 }
  0x11   :  { %2106 = shalt.err (!%p2103_p7)
}
  0x12   :  { %s2182_s11 = smov 512   ;;  %s2183_s12 = smov 32  }
  0x13   :  { %30 = dma.hbm_to_vmem [thread:$0]  %s2505_s1, 8192, %s25_s25, [#allocation3], %s2182_s11, %s2182_s11, %s2183_s12  }
  0x14   :  { %s2184_s15 = smov [#allocation5]   ;;  %s2107_s19 = scalar_lea.hbm %s2507_s3, 8192 }
  0x15   :  { %s38_s16 = sshll.u32 %s2184_s15, 4  ;;  %p2108_p8 = scmp.ne.s32.totalorder %s2507_s3, %s2107_s19  ;;  %s39_s16 = int_to_ptr.vmem [resolvable:$true] %s38_s16 }
  0x16   :  { %p2111_p9 = scmp.lt.u32.totalorder %s2107_s19, %s2507_s3 }
  0x18   :  { %p2113_p10 = pnand %p2111_p9, %p2108_p8 }
  0x1a   :  { %2116 = shalt.err (!%p2113_p10)
}
  0x1b   :  { %s2117_s24 = scalar_lea.vmem %s39_s16, 8192  ;;  %p2122_p12 = scmp.lt.s32.totalorder %s39_s16, %s39_s16 }
  0x1c   :  { %p2118_p11 = scmp.ne.s32.totalorder %s39_s16, %s2117_s24  ;;  %p2123_p13 = scmp.lt.s32.totalorder %s2117_s24, %s2117_s24 }
  0x1e   :  { %p2124_p0 = por %p2123_p13, %p2122_p12 }
  0x20   :  { %p2125_p1 = pnand %p2124_p0, %p2118_p11 }
  0x22   :  { %2128 = shalt.err (!%p2125_p1)
}
  0x23   :  { %s2185_s1 = smov 64   ;;  %s2186_s25 = smov 4  }
  0x24   :  { %44 = dma.hbm_to_vmem [thread:$0]  %s2507_s3, 8192, %s39_s16, [#allocation6], %s2185_s1, %s2185_s1, %s2186_s25  }
  0x25   :  { %2173 = dma.done.wait [#allocation3], 8192  }
  0x26   :  { %2174 = vsyncadd [#allocation3], 4294959104 }
  0x27   :  { %2175 = dma.done.wait [#allocation6], 8192  }
  0x28   :  { %2176 = vsyncadd [#allocation6], 4294959104  ;;  %v2187_v0 = vmov 0   ;;  %v85_v1 = vld [vmem:[#allocation2] sm:$0xff]  ;;  %v86_v3 = vld [vmem:[#allocation2 + $0x8] sm:$0xff]  ;;  %vm2189_vm0 = vmmov 0  }
  0x29   :  { %543 = vmatprep.mubr.bf16.mxu0 %v2187_v0  ;;  %586 = vmatprep.mubr.bf16.mxu1 %v2187_v0  ;;  %v89_v2 = vld [vmem:[#allocation2 + $0x20] sm:$0xff]  ;;  %v90_v5 = vld [vmem:[#allocation2 + $0x28] sm:$0xff]  ;;  %vm1521_vm1 = vcmask 1040384   ;;  %vm1552_vm2 = vcmask 1041408   ;;  %vm1530_vm3 = vcmask 146432   ;;  %s2192_s24 = smov [#allocation8]  }
  0x2a   :  { %v1705_v4 = vcombine.high %v85_v1, %v89_v2  ;;  %v1704_v6 = vcombine.low %v85_v1, %v89_v2  ;;  %v93_v7 = vld [vmem:[#allocation2 + $0x40] sm:$0xff]  ;;  %v1707_v9 = vcombine.high %v86_v3, %v90_v5  ;;  %v1706_v10 = vcombine.low %v86_v3, %v90_v5  ;;  %v94_v12 = vld [vmem:[#allocation2 + $0x48] sm:$0xff]  ;;  %v87_v5 = vld [vmem:[#allocation2 + $0x10] sm:$0xff]  ;;  %s1687_s1 = sshll.u32 %s2192_s24, 4  ;;  %s1688_s1 = int_to_ptr.vmem [resolvable:$true] %s1687_s1 }
  0x2b   :  { %v97_v8 = vld [vmem:[#allocation2 + $0x60] sm:$0xff]  ;;  %v98_v13 = vld [vmem:[#allocation2 + $0x68] sm:$0xff] }
  0x2c   :  { %v1713_v11 = vcombine.high %v93_v7, %v97_v8  ;;  %v101_v14 = vld [vmem:[#allocation2 + $0x80] sm:$0xff]  ;;  %511 = vmatprep.subr.bf16.mxu0 %v1705_v4  ;;  %v1715_v15 = vcombine.high %v94_v12, %v98_v13  ;;  %v102_v17 = vld [vmem:[#allocation2 + $0x88] sm:$0xff]  ;;  %554 = vmatprep.subr.bf16.mxu1 %v1707_v9  ;;  %v1712_v19 = vcombine.low %v93_v7, %v97_v8  ;;  %v88_v9 = vld [vmem:[#allocation2 + $0x18] sm:$0xff] }
  0x2d   :  { %v105_v16 = vld [vmem:[#allocation2 + $0xa0] sm:$0xff]  ;;  %v106_v18 = vld [vmem:[#allocation2 + $0xa8] sm:$0xff]  ;;  %512 = vmatpush1.bf16.msra.mxu0 %v1704_v6  ;;  %555 = vmatpush1.bf16.msra.mxu1 %v1706_v10  ;;  %v1714_v20 = vcombine.low %v94_v12, %v98_v13  ;;  %v91_v6 = vld [vmem:[#allocation2 + $0x30] sm:$0xff] }
  0x2e   :  { %513 = vmatprep.subr.bf16.mxu0 %v1713_v11  ;;  %v1721_v21 = vcombine.high %v101_v14, %v105_v16  ;;  %556 = vmatprep.subr.bf16.mxu1 %v1715_v15  ;;  %v1723_v22 = vcombine.high %v102_v17, %v106_v18  ;;  %v109_v23 = vld [vmem:[#allocation2 + $0xc0] sm:$0xff]  ;;  %v110_v25 = vld [vmem:[#allocation2 + $0xc8] sm:$0xff]  ;;  %v1720_v27 = vcombine.low %v101_v14, %v105_v16  ;;  %v92_v12 = vld [vmem:[#allocation2 + $0x38] sm:$0xff] }
  0x2f   :  { %v113_v24 = vld [vmem:[#allocation2 + $0xe0] sm:$0xff]  ;;  %v114_v26 = vld [vmem:[#allocation2 + $0xe8] sm:$0xff]  ;;  %v1722_v28 = vcombine.low %v102_v17, %v106_v18  ;;  %v1709_v16 = vcombine.high %v87_v5, %v91_v6 }
  0x30   :  { %v1729_v29 = vcombine.high %v109_v23, %v113_v24  ;;  %v1731_v30 = vcombine.high %v110_v25, %v114_v26  ;;  %v117_v31 = vld [vmem:[#allocation2 + $0x100] sm:$0xff]  ;;  %v118_v33 = vld [vmem:[#allocation2 + $0x108] sm:$0xff]  ;;  %v1728_v35 = vcombine.low %v109_v23, %v113_v24  ;;  %v1730_v38 = vcombine.low %v110_v25, %v114_v26 }
  0x31   :  { %514 = vmatpush1.bf16.msra.mxu0 %v1712_v19  ;;  %557 = vmatpush1.bf16.msra.mxu1 %v1714_v20  ;;  %v121_v32 = vld [vmem:[#allocation2 + $0x120] sm:$0xff]  ;;  %v122_v34 = vld [vmem:[#allocation2 + $0x128] sm:$0xff]  ;;  %v1711_v19 = vcombine.high %v88_v9, %v92_v12 }
  0x32   :  { %515 = vmatprep.subr.bf16.mxu0 %v1721_v21  ;;  %558 = vmatprep.subr.bf16.mxu1 %v1723_v22  ;;  %v56_v36 = vld [vmem:[%s2504_s0] sm:$0xff]  ;;  %v57_v37 = vld [vmem:[%s2504_s0 + $0x8] sm:$0xff]  ;;  %v1737_v39 = vcombine.high %v117_v31, %v121_v32  ;;  %v1739_v41 = vcombine.high %v118_v33, %v122_v34  ;;  %v1736_v47 = vcombine.low %v117_v31, %v121_v32  ;;  %v95_v31 = vld [vmem:[#allocation2 + $0x50] sm:$0xff] }
  0x33   :  { %v58_v40 = vadd.f32 %v57_v37, %v56_v36  ;;  %v125_v42 = vld [vmem:[#allocation2 + $0x140] sm:$0xff]  ;;  %v126_v44 = vld [vmem:[#allocation2 + $0x148] sm:$0xff]  ;;  %v1738_v48 = vcombine.low %v118_v33, %v122_v34  ;;  %v99_v32 = vld [vmem:[#allocation2 + $0x70] sm:$0xff] }
  0x34   :  { %v129_v43 = vld [vmem:[#allocation2 + $0x160] sm:$0xff]  ;;  %v130_v45 = vld [vmem:[#allocation2 + $0x168] sm:$0xff]  ;;  %v96_v33 = vld [vmem:[#allocation2 + $0x58] sm:$0xff] }
  0x35   :  { %516 = vmatpush1.bf16.msra.mxu0 %v1720_v27  ;;  %559 = vmatpush1.bf16.msra.mxu1 %v1722_v28  ;;  %v59_v46 = vrot.slane %v58_v40, 4  ;;  %v1745_v49 = vcombine.high %v125_v42, %v129_v43  ;;  %v1747_v51 = vcombine.high %v126_v44, %v130_v45  ;;  %v133_v52 = vld [vmem:[#allocation2 + $0x180] sm:$0xff]  ;;  %v134_v54 = vld [vmem:[#allocation2 + $0x188] sm:$0xff]  ;;  %v1744_v57 = vcombine.low %v125_v42, %v129_v43  ;;  %v100_v34 = vld [vmem:[#allocation2 + $0x78] sm:$0xff] }
  0x36   :  { %517 = vmatprep.subr.bf16.mxu0 %v1729_v29  ;;  %560 = vmatprep.subr.bf16.mxu1 %v1731_v30  ;;  %v137_v53 = vld [vmem:[#allocation2 + $0x1a0] sm:$0xff]  ;;  %v138_v55 = vld [vmem:[#allocation2 + $0x1a8] sm:$0xff]  ;;  %v1746_v58 = vcombine.low %v126_v44, %v130_v45  ;;  %v104_v42 = vld [vmem:[#allocation2 + $0x98] sm:$0xff]  ;;  %v1717_v45 = vcombine.high %v95_v31, %v99_v32 }
  0x37   :  { %v60_v50 = vadd.f32 %v59_v46, %v58_v40  ;;  %v1753_v59 = vcombine.high %v133_v52, %v137_v53  ;;  %v141_v60 = vld [vmem:[#allocation2 + $0x1c0] sm:$0xff]  ;;  %v1755_v63 = vcombine.high %v134_v54, %v138_v55  ;;  %v142_v1 = vld [vmem:[#allocation2 + $0x1c8] sm:$0xff]  ;;  %v1752_v4 = vcombine.low %v133_v52, %v137_v53  ;;  %v103_v40 = vld [vmem:[#allocation2 + $0x90] sm:$0xff] }
  0x38   :  { %v145_v61 = vld [vmem:[#allocation2 + $0x1e0] sm:$0xff]  ;;  %v146_v2 = vld [vmem:[#allocation2 + $0x1e8] sm:$0xff]  ;;  %v1754_v7 = vcombine.low %v134_v54, %v138_v55  ;;  %v108_v43 = vld [vmem:[#allocation2 + $0xb8] sm:$0xff]  ;;  %v1719_v46 = vcombine.high %v96_v33, %v100_v34 }
  0x39   :  { %518 = vmatpush1.bf16.msra.mxu0 %v1728_v35  ;;  %561 = vmatpush1.bf16.msra.mxu1 %v1730_v38  ;;  %v61_v56 = vrot.slane %v60_v50, 2  ;;  %v1761_v8 = vcombine.high %v141_v60, %v145_v61  ;;  %v1763_v11 = vcombine.high %v142_v1, %v146_v2  ;;  %v1760_v14 = vcombine.low %v141_v60, %v145_v61  ;;  %v115_v52 = vld [vmem:[#allocation2 + $0xf0] sm:$0xff]  ;;  %v112_v53 = vld [vmem:[#allocation2 + $0xd8] sm:$0xff] }
  0x3a   :  { %519 = vmatprep.subr.bf16.mxu0 %v1737_v39  ;;  %562 = vmatprep.subr.bf16.mxu1 %v1739_v41  ;;  %v1762_v15 = vcombine.low %v142_v1, %v146_v2  ;;  %v1708_v38 = vcombine.low %v87_v5, %v91_v6  ;;  %v1710_v39 = vcombine.low %v88_v9, %v92_v12  ;;  %v107_v41 = vld [vmem:[#allocation2 + $0xb0] sm:$0xff]  ;;  %v116_v54 = vld [vmem:[#allocation2 + $0xf8] sm:$0xff] }
  0x3b   :  { %v62_v62 = vadd.f32 %v61_v56, %v60_v50  ;;  %v1727_v50 = vcombine.high %v104_v42, %v108_v43  ;;  %v1724_v55 = vcombine.low %v103_v40, %v107_v41  ;;  %v1726_v56 = vcombine.low %v104_v42, %v108_v43  ;;  %v123_v60 = vld [vmem:[#allocation2 + $0x130] sm:$0xff]  ;;  %v120_v61 = vld [vmem:[#allocation2 + $0x118] sm:$0xff] }
  0x3c   :  { %v1734_v1 = vcombine.low %v112_v53, %v116_v54  ;;  %v128_v5 = vld [vmem:[#allocation2 + $0x158] sm:$0xff]  ;;  %v139_v12 = vld [vmem:[#allocation2 + $0x1b0] sm:$0xff] }
  0x3d   :  { %520 = vmatpush1.bf16.msra.mxu0 %v1736_v47  ;;  %563 = vmatpush1.bf16.msra.mxu1 %v1738_v48  ;;  %v63_v3 = vrot.slane %v62_v62, 1  ;;  %v1716_v47 = vcombine.low %v95_v31, %v99_v32  ;;  %v1718_v48 = vcombine.low %v96_v33, %v100_v34  ;;  %v132_v6 = vld [vmem:[#allocation2 + $0x178] sm:$0xff]  ;;  %v1987_v31 = vld [vmem:[#allocation5 + $0x40] sm:$0xff]   ;;  %v1995_v42 = vld [vmem:[#allocation5 + $0x50] sm:$0xff]  }
  0x3e   :  { %521 = vmatprep.subr.bf16.mxu0 %v1745_v49  ;;  %564 = vmatprep.subr.bf16.mxu1 %v1747_v51  ;;  %v1725_v49 = vcombine.high %v103_v40, %v107_v41  ;;  %v111_v51 = vld [vmem:[#allocation2 + $0xd0] sm:$0xff]  ;;  %v1988_v32 = vld [vmem:[#allocation5 + $0xc0] sm:$0xff]   ;;  %v1993_v40 = vld [vmem:[#allocation5 + $0x8] sm:$0xff]  }
  0x3f   :  { %v64_v10 = vadd.f32 %v63_v3, %v62_v62  ;;  %v124_v62 = vld [vmem:[#allocation2 + $0x138] sm:$0xff]  ;;  %v127_v3 = vld [vmem:[#allocation2 + $0x150] sm:$0xff]  ;;  %v1989_v33 = vld [vmem:[#allocation5] sm:$0xff]  }
  0x40   :  { %v1990_v34 = vld [vmem:[#allocation5 + $0x80] sm:$0xff]   ;;  %v1994_v41 = vld [vmem:[#allocation5 + $0x88] sm:$0xff]   ;;  %v1996_v43 = vld [vmem:[#allocation5 + $0xd0] sm:$0xff]  }
  0x41   :  { %522 = vmatpush1.bf16.msra.mxu0 %v1744_v57  ;;  %565 = vmatpush1.bf16.msra.mxu1 %v1746_v58  ;;  %v2267_v13 = vmul.f32 0.0625, %v64_v10  ;;  %v1733_v57 = vcombine.high %v111_v51, %v115_v52  ;;  %v1735_v58 = vcombine.high %v112_v53, %v116_v54  ;;  %v1751_v10 = vcombine.high %v128_v5, %v132_v6  ;;  %v2006_v53 = vld [vmem:[#allocation5 + $0xa0] sm:$0xff]   ;;  %v2007_v54 = vld [vmem:[#allocation5 + $0x68] sm:$0xff]  }
  0x42   :  { %523 = vmatprep.subr.bf16.mxu0 %v1753_v59  ;;  %566 = vmatprep.subr.bf16.mxu1 %v1755_v63  ;;  %v119_v59 = vld [vmem:[#allocation2 + $0x110] sm:$0xff]  ;;  %v1732_v63 = vcombine.low %v111_v51, %v115_v52  ;;  %v2004_v51 = vld [vmem:[#allocation5 + $0xe0] sm:$0xff]  }
  0x43   :  { %v67_v17 = vsub.f32 %v56_v36, %v2267_v13  ;;  %v68_v18 = vsub.f32 %v57_v37, %v2267_v13  ;;  %v1741_v2 = vcombine.high %v119_v59, %v123_v60  ;;  %v2005_v52 = vld [vmem:[#allocation5 + $0x20] sm:$0xff]  }
  0x45   :  { %524 = vmatpush1.bf16.msra.mxu0 %v1752_v4  ;;  %567 = vmatpush1.bf16.msra.mxu1 %v1754_v7  ;;  %v69_v20 = vmul.f32 %v67_v17, %v67_v17  ;;  %v70_v21 = vmul.f32 %v68_v18, %v68_v18  ;;  %v131_v4 = vld [vmem:[#allocation2 + $0x170] sm:$0xff]  ;;  %v1740_v7 = vcombine.low %v119_v59, %v123_v60 }
  0x46   :  { %525 = vmatprep.subr.bf16.mxu0 %v1761_v8  ;;  %568 = vmatprep.subr.bf16.mxu1 %v1763_v11  ;;  %v1742_v8 = vcombine.low %v120_v61, %v124_v62  ;;  %v1749_v9 = vcombine.high %v127_v3, %v131_v4  ;;  %v135_v11 = vld [vmem:[#allocation2 + $0x190] sm:$0xff] }
  0x47   :  { %v71_v22 = vadd.f32 %v70_v21, %v69_v20  ;;  %v143_v20 = vld [vmem:[#allocation2 + $0x1d0] sm:$0xff] }
  0x48   :  { %v147_v21 = vld [vmem:[#allocation2 + $0x1f0] sm:$0xff] }
  0x49   :  { %526 = vmatpush1.bf16.msra.mxu0 %v1760_v14  ;;  %569 = vmatpush1.bf16.msra.mxu1 %v1762_v15  ;;  %v72_v23 = vrot.slane %v71_v22, 4  ;;  %v136_v14 = vld [vmem:[#allocation2 + $0x198] sm:$0xff]  ;;  %v2012_v59 = vld [vmem:[#allocation5 + $0xf0] sm:$0xff]  }
  0x4a   :  { %597 = vmatprep.subr.bf16.mxu0 %v1709_v16  ;;  %640 = vmatprep.subr.bf16.mxu1 %v1711_v19  ;;  %v140_v15 = vld [vmem:[#allocation2 + $0x1b8] sm:$0xff]  ;;  %v1748_v16 = vcombine.low %v127_v3, %v131_v4  ;;  %v2013_v60 = vld [vmem:[#allocation5 + $0x30] sm:$0xff]   ;;  %v2020_v3 = vld [vmem:[#allocation5 + $0x1c0] sm:$0xff]   ;;  %v151_v4 = vlaneseq }
  0x4b   :  { %v73_v24 = vadd.f32 %v72_v23, %v71_v22  ;;  %v1759_v19 = vcombine.high %v136_v14, %v140_v15  ;;  %v144_v22 = vld [vmem:[#allocation2 + $0x1d8] sm:$0xff] }
  0x4c   :  { %v148_v23 = vld [vmem:[#allocation2 + $0x1f8] sm:$0xff] }
  0x4d   :  { %v74_v25 = vrot.slane %v73_v24, 2 }
  0x4f   :  { %v75_v26 = vadd.f32 %v74_v25, %v73_v24  ;;  %v1756_v24 = vcombine.low %v135_v11, %v139_v12  ;;  %v1758_v25 = vcombine.low %v136_v14, %v140_v15 }
  0x51   :  { %v76_v27 = vrot.slane %v75_v26, 1 }
  0x53   :  { %v77_v28 = vadd.f32 %v76_v27, %v75_v26  ;;  %v1765_v26 = vcombine.high %v143_v20, %v147_v21  ;;  %v1767_v27 = vcombine.high %v144_v22, %v148_v23 }
  0x55   :  { %v78_v29 = vmul.f32 0.06666667, %v77_v28  ;;  %v1764_v28 = vcombine.low %v143_v20, %v147_v21 }
  0x57   :  { %v2271_v30 = vadd.f32 1e-05, %v78_v29  ;;  %v1766_v29 = vcombine.low %v144_v22, %v148_v23 }
  0x59   :  { %2051 = vrsqrt.f32 %v2271_v30 }
  0x63   :  { %v2274_v35 = vpop.eup %2051 }
  0x64   :  { %v2277_v36 = vmul.f32 %v2274_v35, %v67_v17  ;;  %v2280_v37 = vmul.f32 %v2274_v35, %v68_v18  ;;  %v1750_v17 = vcombine.low %v128_v5, %v132_v6  ;;  %v1757_v18 = vcombine.high %v135_v11, %v139_v12 }
  0x65   :  { %v2292_v5 = vshrl.u32 %v151_v4, 7 }
  0x66   :  { %v2284_v44 = vpack.c.bf16 %v2280_v37, %v2277_v36 }
  0x67   :  { %v153_v6 = vsub.s32 0, %v2292_v5 }
  0x68   :  { %544 = vmatmul.mubr.bf16.vlgmr.msra.gmra.mrb[0].mxu0 %v2284_v44  ;;  %587 = vmatmul.mubr.bf16.vlgmr.msra.gmra.mrb[0].mxu1 %v2284_v44 }
  0x69   :  { %598 = vmatpush1.bf16.msra.mxu0 %v1708_v38  ;;  %641 = vmatpush1.bf16.msra.mxu1 %v1710_v39  ;;  %v1991_v38 = vld [vmem:[#allocation5 + $0x48] sm:$0xff]  }
  0x6a   :  { %599 = vmatprep.subr.bf16.mxu0 %v1717_v45  ;;  %642 = vmatprep.subr.bf16.mxu1 %v1719_v46  ;;  %v1992_v39 = vld [vmem:[#allocation5 + $0xc8] sm:$0xff]   ;;  %v1997_v45 = vld [vmem:[#allocation5 + $0x10] sm:$0xff]   ;;  %v1999_v46 = vld [vmem:[#allocation5 + $0x58] sm:$0xff]  }
  0x6b   :  { %629 = vmatprep.mubr.bf16.mxu0 %v2187_v0  ;;  %672 = vmatprep.mubr.bf16.mxu1 %v2187_v0  ;;  %v1743_v0 = vcombine.high %v120_v61, %v124_v62  ;;  %v2014_v61 = vld [vmem:[#allocation5 + $0xb0] sm:$0xff]   ;;  %v2015_v62 = vld [vmem:[#allocation5 + $0x78] sm:$0xff]  }
  0x6d   :  { %600 = vmatpush1.bf16.msra.mxu0 %v1716_v47  ;;  %643 = vmatpush1.bf16.msra.mxu1 %v1718_v48  ;;  %v2000_v47 = vld [vmem:[#allocation5 + $0xd8] sm:$0xff]  }
  0x6e   :  { %601 = vmatprep.subr.bf16.mxu0 %v1725_v49  ;;  %644 = vmatprep.subr.bf16.mxu1 %v1727_v50  ;;  %v2001_v48 = vld [vmem:[#allocation5 + $0x18] sm:$0xff]   ;;  %v2003_v50 = vld [vmem:[#allocation5 + $0x60] sm:$0xff]  }
  0x6f   :  { %v2002_v49 = vld [vmem:[#allocation5 + $0x98] sm:$0xff]  }
  0x71   :  { %602 = vmatpush1.bf16.msra.mxu0 %v1724_v55  ;;  %645 = vmatpush1.bf16.msra.mxu1 %v1726_v56  ;;  %v2008_v55 = vld [vmem:[#allocation5 + $0xe8] sm:$0xff]  }
  0x72   :  { %603 = vmatprep.subr.bf16.mxu0 %v1733_v57  ;;  %646 = vmatprep.subr.bf16.mxu1 %v1735_v58  ;;  %v2009_v56 = vld [vmem:[#allocation5 + $0x28] sm:$0xff]   ;;  %v2011_v58 = vld [vmem:[#allocation5 + $0x70] sm:$0xff]  }
  0x73   :  { %v2010_v57 = vld [vmem:[#allocation5 + $0xa8] sm:$0xff]  }
  0x75   :  { %604 = vmatpush1.bf16.msra.mxu0 %v1732_v63  ;;  %647 = vmatpush1.bf16.msra.mxu1 %v1734_v1  ;;  %v2016_v63 = vld [vmem:[#allocation5 + $0xf8] sm:$0xff]  }
  0x76   :  { %605 = vmatprep.subr.bf16.mxu0 %v1741_v2  ;;  %648 = vmatprep.subr.bf16.mxu1 %v1743_v0  ;;  %v2017_v1 = vld [vmem:[#allocation5 + $0x38] sm:$0xff]   ;;  %v2019_v0 = vld [vmem:[#allocation5 + $0x140] sm:$0xff]  }
  0x77   :  { %v2018_v2 = vld [vmem:[#allocation5 + $0xb8] sm:$0xff]  }
  0x79   :  { %606 = vmatpush1.bf16.msra.mxu0 %v1740_v7  ;;  %649 = vmatpush1.bf16.msra.mxu1 %v1742_v8  ;;  %v161_v7 = vsub.s32 2, %v2292_v5  ;;  %v2299_v8 = vld [vmem:[%s2506_s2] sm:$0xff] }
  0x7a   :  { %607 = vmatprep.subr.bf16.mxu0 %v1749_v9  ;;  %650 = vmatprep.subr.bf16.mxu1 %v1751_v10  ;;  %v157_v9 = vsub.s32 1, %v2292_v5  ;;  %v165_v10 = vsub.s32 3, %v2292_v5  ;;  %v154_v11 = vrot.slane %v2299_v8, %v153_v6 }
  0x7b   :  { %v162_v12 = vrot.slane %v2299_v8, %v161_v7 }
  0x7c   :  { %v158_v14 = vrot.slane %v2299_v8, %v157_v9  ;;  %v166_v15 = vrot.slane %v2299_v8, %v165_v10 }
  0x7d   :  { %608 = vmatpush1.bf16.msra.mxu0 %v1748_v16  ;;  %651 = vmatpush1.bf16.msra.mxu1 %v1750_v17 }
  0x7e   :  { %609 = vmatprep.subr.bf16.mxu0 %v1757_v18  ;;  %652 = vmatprep.subr.bf16.mxu1 %v1759_v19 }
  0x81   :  { %610 = vmatpush1.bf16.msra.mxu0 %v1756_v24  ;;  %653 = vmatpush1.bf16.msra.mxu1 %v1758_v25 }
  0x82   :  { %611 = vmatprep.subr.bf16.mxu0 %v1765_v26  ;;  %654 = vmatprep.subr.bf16.mxu1 %v1767_v27 }
  0x85   :  { %612 = vmatpush1.bf16.msra.mxu0 %v1764_v28  ;;  %655 = vmatpush1.bf16.msra.mxu1 %v1766_v29 }
  0x86   :  { %1841 = vmatprep.subr.bf16.mxu0 %v1987_v31  ;;  %1863 = vmatprep.subr.bf16.mxu1 %v1988_v32 }
  0x88   :  { %630 = vmatmul.mubr.bf16.vlgmr.msra.gmra.mrb[4].mxu0 %v2284_v44  ;;  %673 = vmatmul.mubr.bf16.vlgmr.msra.gmra.mrb[4].mxu1 %v2284_v44  ;;  %v1998_v44 = vld [vmem:[#allocation5 + $0x90] sm:$0xff]  }
  0x89   :  { %1842 = vmatpush3.bf16.msra.mxu0 %v1989_v33  ;;  %1864 = vmatpush3.bf16.msra.mxu1 %v1990_v34 }
  0x8a   :  { %1843 = vmatprep.subr.bf16.mxu0 %v1991_v38  ;;  %1865 = vmatprep.subr.bf16.mxu1 %v1992_v39 }
  0x8d   :  { %1844 = vmatpush3.bf16.msra.mxu0 %v1993_v40  ;;  %1866 = vmatpush3.bf16.msra.mxu1 %v1994_v41 }
  0x8e   :  { %1845 = vmatprep.subr.bf16.mxu0 %v1995_v42  ;;  %1867 = vmatprep.subr.bf16.mxu1 %v1996_v43 }
  0x91   :  { %1846 = vmatpush3.bf16.msra.mxu0 %v1997_v45  ;;  %1868 = vmatpush3.bf16.msra.mxu1 %v1998_v44 }
  0x92   :  { %1847 = vmatprep.subr.bf16.mxu0 %v1999_v46  ;;  %1869 = vmatprep.subr.bf16.mxu1 %v2000_v47 }
  0x95   :  { %1848 = vmatpush3.bf16.msra.mxu0 %v2001_v48  ;;  %1870 = vmatpush3.bf16.msra.mxu1 %v2002_v49 }
  0x96   :  { %1849 = vmatprep.subr.bf16.mxu0 %v2003_v50  ;;  %1871 = vmatprep.subr.bf16.mxu1 %v2004_v51 }
  0x99   :  { %1850 = vmatpush3.bf16.msra.mxu0 %v2005_v52  ;;  %1872 = vmatpush3.bf16.msra.mxu1 %v2006_v53 }
  0x9a   :  { %1851 = vmatprep.subr.bf16.mxu0 %v2007_v54  ;;  %1873 = vmatprep.subr.bf16.mxu1 %v2008_v55 }
  0x9d   :  { %1852 = vmatpush3.bf16.msra.mxu0 %v2009_v56  ;;  %1874 = vmatpush3.bf16.msra.mxu1 %v2010_v57 }
  0x9e   :  { %1853 = vmatprep.subr.bf16.mxu0 %v2011_v58  ;;  %1875 = vmatprep.subr.bf16.mxu1 %v2012_v59 }
  0xa1   :  { %1854 = vmatpush3.bf16.msra.mxu0 %v2013_v60  ;;  %1876 = vmatpush3.bf16.msra.mxu1 %v2014_v61 }
  0xa2   :  { %1855 = vmatprep.subr.bf16.mxu0 %v2015_v62  ;;  %1877 = vmatprep.subr.bf16.mxu1 %v2016_v63 }
  0xa5   :  { %1856 = vmatpush3.bf16.msra.mxu0 %v2017_v1  ;;  %1878 = vmatpush3.bf16.msra.mxu1 %v2018_v2 }
  0xa6   :  { %1885 = vmatprep.subr.bf16.mxu0 %v2019_v0  ;;  %1907 = vmatprep.subr.bf16.mxu1 %v2020_v3 }
 0x13b   :  { %v545_v16 = vpop.f32.mrb[0].mxu0  ;;  %v588_v17 = vpop.f32.mrb[0].mxu1 }
 0x13c   :  { %v2307_v18 = vadd.f32 %v545_v16, %v154_v11  ;;  %v2309_v19 = vadd.f32 %v588_v17, %v162_v12  ;;  %v547_v20 = vpop.f32.mrb[1].mxu0  ;;  %v590_v21 = vpop.f32.mrb[1].mxu1  ;;  %v177_v16 = vsub.s32 6, %v2292_v5 }
 0x13d   :  { %v2311_v22 = vadd.f32 %v547_v20, %v158_v14  ;;  %v2313_v23 = vadd.f32 %v590_v21, %v166_v15  ;;  %v549_v24 = vpop.f32.mrb[2].mxu0  ;;  %v592_v25 = vpop.f32.mrb[2].mxu1  ;;  %v173_v20 = vsub.s32 5, %v2292_v5 }
 0x13e   :  { %v699_v26 = vmul.f32 0.044715, %v2307_v18  ;;  %v701_v27 = vmul.f32 0.044715, %v2309_v19  ;;  %v2317_v28 = vadd.f32 %v549_v24, %v154_v11  ;;  %v2319_v29 = vadd.f32 %v592_v25, %v162_v12  ;;  %v551_v31 = vpop.f32.mrb[3].mxu0  ;;  %v594_v32 = vpop.f32.mrb[3].mxu1 }
 0x13f   :  { %v700_v33 = vmul.f32 0.044715, %v2311_v22  ;;  %v702_v34 = vmul.f32 0.044715, %v2313_v23  ;;  %v2323_v38 = vadd.f32 %v551_v31, %v158_v14  ;;  %v2325_v39 = vadd.f32 %v594_v32, %v166_v15 }
 0x140   :  { %v715_v40 = vmul.f32 %v699_v26, %v2307_v18  ;;  %v717_v41 = vmul.f32 %v701_v27, %v2309_v19  ;;  %v707_v42 = vmul.f32 0.044715, %v2317_v28  ;;  %v709_v43 = vmul.f32 0.044715, %v2319_v29 }
 0x141   :  { %v716_v45 = vmul.f32 %v700_v33, %v2311_v22  ;;  %v718_v44 = vmul.f32 %v702_v34, %v2313_v23  ;;  %v708_v46 = vmul.f32 0.044715, %v2323_v38  ;;  %v710_v47 = vmul.f32 0.044715, %v2325_v39 }
 0x142   :  { %v731_v48 = vmul.f32 %v715_v40, %v2307_v18  ;;  %v733_v49 = vmul.f32 %v717_v41, %v2309_v19  ;;  %v723_v50 = vmul.f32 %v707_v42, %v2317_v28  ;;  %v725_v51 = vmul.f32 %v709_v43, %v2319_v29 }
 0x143   :  { %v732_v52 = vmul.f32 %v716_v45, %v2311_v22  ;;  %v734_v53 = vmul.f32 %v718_v44, %v2313_v23  ;;  %v724_v54 = vmul.f32 %v708_v46, %v2323_v38  ;;  %v726_v55 = vmul.f32 %v710_v47, %v2325_v39 }
 0x144   :  { %v747_v56 = vadd.f32 %v731_v48, %v2307_v18  ;;  %v749_v57 = vadd.f32 %v733_v49, %v2309_v19  ;;  %v739_v58 = vmul.f32 %v723_v50, %v2317_v28  ;;  %v741_v59 = vmul.f32 %v725_v51, %v2319_v29 }
 0x145   :  { %v740_v60 = vmul.f32 %v724_v54, %v2323_v38  ;;  %v742_v61 = vmul.f32 %v726_v55, %v2325_v39  ;;  %v748_v0 = vadd.f32 %v732_v52, %v2311_v22  ;;  %v750_v7 = vadd.f32 %v734_v53, %v2313_v23 }
 0x146   :  { %v763_v62 = vmul.f32 0.7978846, %v747_v56  ;;  %v765_v63 = vmul.f32 0.7978846, %v749_v57  ;;  %v755_v1 = vadd.f32 %v739_v58, %v2317_v28  ;;  %v757_v2 = vadd.f32 %v741_v59, %v2319_v29 }
 0x147   :  { %v756_v3 = vadd.f32 %v740_v60, %v2323_v38  ;;  %v764_v9 = vmul.f32 0.7978846, %v748_v0  ;;  %v758_v11 = vadd.f32 %v742_v61, %v2325_v39  ;;  %v766_v12 = vmul.f32 0.7978846, %v750_v7 }
 0x148   :  { %2053 = vtanh.f32 %v763_v62  ;;  %v771_v4 = vmul.f32 0.7978846, %v755_v1  ;;  %v773_v6 = vmul.f32 0.7978846, %v757_v2  ;;  %v169_v15 = vsub.s32 4, %v2292_v5 }
 0x149   :  { %2055 = vtanh.f32 %v765_v63  ;;  %v772_v10 = vmul.f32 0.7978846, %v756_v3  ;;  %v774_v14 = vmul.f32 0.7978846, %v758_v11  ;;  %v178_v27 = vrot.slane %v2299_v8, %v177_v16  ;;  %v2021_v3 = vld [vmem:[#allocation5 + $0x100] sm:$0xff]  }
 0x14a   :  { %2057 = vtanh.f32 %v771_v4  ;;  %v170_v26 = vrot.slane %v2299_v8, %v169_v15  ;;  %v181_v33 = vsub.s32 7, %v2292_v5  ;;  %v683_v34 = vmul.f32 0.5, %v2307_v18 }
 0x14b   :  { %2059 = vtanh.f32 %v773_v6  ;;  %v691_v40 = vmul.f32 0.5, %v2317_v28  ;;  %v174_v43 = vrot.slane %v2299_v8, %v173_v20  ;;  %v685_v45 = vmul.f32 0.5, %v2309_v19 }
 0x14c   :  { %2061 = vtanh.f32 %v764_v9  ;;  %v693_v44 = vmul.f32 0.5, %v2319_v29  ;;  %v684_v48 = vmul.f32 0.5, %v2311_v22  ;;  %v692_v18 = vmul.f32 0.5, %v2323_v38 }
 0x14d   :  { %2063 = vtanh.f32 %v772_v10  ;;  %v182_v55 = vrot.slane %v2299_v8, %v181_v33  ;;  %v694_v19 = vmul.f32 0.5, %v2325_v39  ;;  %v686_v62 = vmul.f32 0.5, %v2313_v23  ;;  %v2023_v10 = vld [vmem:[#allocation5 + $0x148] sm:$0xff]  }
 0x14e   :  { %2065 = vtanh.f32 %v766_v12  ;;  %v2024_v33 = vld [vmem:[#allocation5 + $0x1c8] sm:$0xff]  }
 0x14f   :  { %2067 = vtanh.f32 %v774_v14 }
 0x152   :  { %v2054_v17 = vpop.eup %2053 }
 0x153   :  { %v2056_v21 = vpop.eup %2055  ;;  %v795_v24 = vadd.f32 1.0, %v2054_v17 }
 0x154   :  { %v2058_v25 = vpop.eup %2057  ;;  %v797_v31 = vadd.f32 1.0, %v2056_v21 }
 0x155   :  { %v2060_v32 = vpop.eup %2059  ;;  %v803_v41 = vadd.f32 1.0, %v2058_v25  ;;  %v811_v50 = vmul.f32 %v795_v24, %v683_v34  ;;  %v2022_v25 = vld [vmem:[#allocation5 + $0x180] sm:$0xff]  }
 0x156   :  { %v2062_v42 = vpop.eup %2061  ;;  %v805_v46 = vadd.f32 1.0, %v2060_v32  ;;  %v813_v28 = vmul.f32 %v797_v31, %v685_v45 }
 0x157   :  { %v2064_v47 = vpop.eup %2063  ;;  %v796_v49 = vadd.f32 1.0, %v2062_v42  ;;  %v819_v51 = vmul.f32 %v803_v41, %v691_v40 }
 0x158   :  { %v2066_v5 = vpop.eup %2065  ;;  %v804_v52 = vadd.f32 1.0, %v2064_v47  ;;  %v821_v53 = vmul.f32 %v805_v46, %v693_v44 }
 0x159   :  { %v2068_v54 = vpop.eup %2067  ;;  %v798_v56 = vadd.f32 1.0, %v2066_v5  ;;  %v827_v29 = vpack.c.bf16 %v819_v51, %v811_v50  ;;  %v812_v57 = vmul.f32 %v796_v49, %v684_v48  ;;  %v2027_v48 = vld [vmem:[#allocation5 + $0x150] sm:$0xff]   ;;  %v2026_v5 = vld [vmem:[#allocation5 + $0x188] sm:$0xff]  }
 0x15a   :  { %v820_v58 = vmul.f32 %v804_v52, %v692_v18  ;;  %v806_v59 = vadd.f32 1.0, %v2068_v54  ;;  %v829_v22 = vpack.c.bf16 %v821_v53, %v813_v28  ;;  %v2028_v54 = vld [vmem:[#allocation5 + $0x1d0] sm:$0xff]  }
 0x15b   :  { %v631_v60 = vpop.f32.mrb[4].mxu0  ;;  %v674_v61 = vpop.f32.mrb[4].mxu1  ;;  %v814_v9 = vmul.f32 %v798_v56, %v686_v62  ;;  %v2030_v62 = vld [vmem:[#allocation5 + $0x190] sm:$0xff]  }
 0x15c   :  { %v2371_v63 = vadd.f32 %v631_v60, %v170_v26  ;;  %v2373_v38 = vadd.f32 %v674_v61, %v178_v27  ;;  %v633_v1 = vpop.f32.mrb[5].mxu0  ;;  %v676_v2 = vpop.f32.mrb[5].mxu1  ;;  %v828_v0 = vpack.c.bf16 %v820_v58, %v812_v57  ;;  %v822_v8 = vmul.f32 %v806_v59, %v694_v19  ;;  %v2031_v60 = vld [vmem:[#allocation5 + $0x158] sm:$0xff]  }
 0x15d   :  { %v2375_v39 = vadd.f32 %v633_v1, %v174_v43  ;;  %v2377_v4 = vadd.f32 %v676_v2, %v182_v55  ;;  %v635_v6 = vpop.f32.mrb[6].mxu0  ;;  %v678_v7 = vpop.f32.mrb[6].mxu1 }
 0x15e   :  { %v703_v11 = vmul.f32 0.044715, %v2371_v63  ;;  %v705_v23 = vmul.f32 0.044715, %v2373_v38  ;;  %v2381_v12 = vadd.f32 %v635_v6, %v170_v26  ;;  %v2383_v14 = vadd.f32 %v678_v7, %v178_v27  ;;  %1386 = vmatprep.mubr.bf16.mxu0 %v828_v0  ;;  %v637_v15 = vpop.f32.mrb[7].mxu0  ;;  %v680_v16 = vpop.f32.mrb[7].mxu1 }
 0x15f   :  { %v704_v17 = vmul.f32 0.044715, %v2375_v39  ;;  %v706_v20 = vmul.f32 0.044715, %v2377_v4  ;;  %v830_v21 = vpack.c.bf16 %v822_v8, %v814_v9  ;;  %v2387_v24 = vadd.f32 %v637_v15, %v174_v43  ;;  %1387 = vmatmul.mubr.bf16.vlgmr.msra.gmra.mrb[8].mxu0 %v827_v29  ;;  %v2025_v43 = vld [vmem:[#allocation5 + $0x108] sm:$0xff]   ;;  %v2029_v29 = vld [vmem:[#allocation5 + $0x110] sm:$0xff]  }
 0x160   :  { %v719_v31 = vmul.f32 %v703_v11, %v2371_v63  ;;  %v721_v32 = vmul.f32 %v705_v23, %v2373_v38  ;;  %v711_v26 = vmul.f32 0.044715, %v2381_v12  ;;  %v713_v27 = vmul.f32 0.044715, %v2383_v14  ;;  %1886 = vmatpush3.bf16.msra.mxu0 %v2021_v3  ;;  %v2032_v3 = vld [vmem:[#allocation5 + $0x1d8] sm:$0xff]   ;;  %v2035_v11 = vld [vmem:[#allocation5 + $0x160] sm:$0xff]  }
 0x161   :  { %v720_v34 = vmul.f32 %v704_v17, %v2375_v39  ;;  %v722_v40 = vmul.f32 %v706_v20, %v2377_v4  ;;  %1427 = vmatprep.mubr.bf16.mxu1 %v830_v21  ;;  %v712_v41 = vmul.f32 0.044715, %v2387_v24  ;;  %v2396_v42 = vadd.f32 %v680_v16, %v182_v55  ;;  %1887 = vmatprep.subr.bf16.mxu0 %v2023_v10  ;;  %v2033_v6 = vld [vmem:[#allocation5 + $0x118] sm:$0xff]   ;;  %v2036_v17 = vld [vmem:[#allocation5 + $0x1e0] sm:$0xff]  }
 0x162   :  { %v735_v45 = vmul.f32 %v719_v31, %v2371_v63  ;;  %v737_v44 = vmul.f32 %v721_v32, %v2373_v38  ;;  %v727_v46 = vmul.f32 %v711_v26, %v2381_v12  ;;  %v729_v47 = vmul.f32 %v713_v27, %v2383_v14  ;;  %1428 = vmatmul.mubr.bf16.vlgmr.msra.gmra.mrb[8].mxu1 %v829_v22  ;;  %v2034_v15 = vld [vmem:[#allocation5 + $0x198] sm:$0xff]   ;;  %v2037_v21 = vld [vmem:[#allocation5 + $0x120] sm:$0xff]   ;;  %v2040_v32 = vld [vmem:[#allocation5 + $0x1e8] sm:$0xff]  }
 0x163   :  { %v736_v49 = vmul.f32 %v720_v34, %v2375_v39  ;;  %v728_v50 = vmul.f32 %v712_v41, %v2387_v24  ;;  %v714_v51 = vmul.f32 0.044715, %v2396_v42  ;;  %1908 = vmatpush3.bf16.msra.mxu1 %v2022_v25  ;;  %v738_v55 = vmul.f32 %v722_v40, %v2377_v4  ;;  %v2039_v25 = vld [vmem:[#allocation5 + $0x168] sm:$0xff]   ;;  %v2038_v31 = vld [vmem:[#allocation5 + $0x1a0] sm:$0xff]  }
 0x164   :  { %v751_v18 = vadd.f32 %v735_v45, %v2371_v63  ;;  %v753_v52 = vadd.f32 %v737_v44, %v2373_v38  ;;  %v743_v28 = vmul.f32 %v727_v46, %v2381_v12  ;;  %v745_v53 = vmul.f32 %v729_v47, %v2383_v14  ;;  %1909 = vmatprep.subr.bf16.mxu1 %v2024_v33  ;;  %v2041_v26 = vld [vmem:[#allocation5 + $0x128] sm:$0xff]   ;;  %v2043_v33 = vld [vmem:[#allocation5 + $0x170] sm:$0xff]  }
 0x165   :  { %v744_v19 = vmul.f32 %v728_v50, %v2387_v24  ;;  %v730_v56 = vmul.f32 %v714_v51, %v2396_v42  ;;  %1888 = vmatpush3.bf16.msra.mxu0 %v2025_v43  ;;  %v752_v1 = vadd.f32 %v736_v49, %v2375_v39  ;;  %v754_v10 = vadd.f32 %v738_v55, %v2377_v4  ;;  %v2042_v40 = vld [vmem:[#allocation5 + $0x1a8] sm:$0xff]   ;;  %v2044_v45 = vld [vmem:[#allocation5 + $0x1f0] sm:$0xff]  }
 0x166   :  { %v767_v57 = vmul.f32 0.7978846, %v751_v18  ;;  %v769_v58 = vmul.f32 0.7978846, %v753_v52  ;;  %v759_v59 = vadd.f32 %v743_v28, %v2381_v12  ;;  %v761_v22 = vadd.f32 %v745_v53, %v2383_v14  ;;  %1889 = vmatprep.subr.bf16.mxu0 %v2027_v48  ;;  %v2045_v47 = vld [vmem:[#allocation5 + $0x130] sm:$0xff]  }
 0x167   :  { %v746_v61 = vmul.f32 %v730_v56, %v2396_v42  ;;  %1910 = vmatpush3.bf16.msra.mxu1 %v2026_v5  ;;  %v760_v2 = vadd.f32 %v744_v19, %v2387_v24  ;;  %v768_v7 = vmul.f32 0.7978846, %v752_v1  ;;  %v770_v16 = vmul.f32 0.7978846, %v754_v10  ;;  %v2047_v5 = vld [vmem:[#allocation5 + $0x178] sm:$0xff]  }
 0x168   :  { %2069 = vtanh.f32 %v767_v57  ;;  %v775_v0 = vmul.f32 0.7978846, %v759_v59  ;;  %v777_v8 = vmul.f32 0.7978846, %v761_v22  ;;  %1911 = vmatprep.subr.bf16.mxu1 %v2028_v54  ;;  %v687_v48 = vmul.f32 0.5, %v2371_v63  ;;  %v2046_v54 = vld [vmem:[#allocation5 + $0x1b0] sm:$0xff]  }
 0x169   :  { %2071 = vtanh.f32 %v769_v58  ;;  %1890 = vmatpush3.bf16.msra.mxu0 %v2029_v29  ;;  %v776_v9 = vmul.f32 0.7978846, %v760_v2  ;;  %v762_v23 = vadd.f32 %v746_v61, %v2396_v42  ;;  %v695_v49 = vmul.f32 0.5, %v2381_v12  ;;  %v2048_v12 = vld [vmem:[#allocation5 + $0x1f8] sm:$0xff]  }
 0x16a   :  { %2073 = vtanh.f32 %v775_v0  ;;  %1891 = vmatprep.subr.bf16.mxu0 %v2031_v60  ;;  %v689_v18 = vmul.f32 0.5, %v2373_v38  ;;  %v697_v52 = vmul.f32 0.5, %v2383_v14  ;;  %v688_v55 = vmul.f32 0.5, %v2375_v39  ;;  %v2049_v14 = vld [vmem:[#allocation5 + $0x138] sm:$0xff]  }
 0x16b   :  { %2075 = vtanh.f32 %v777_v8  ;;  %1912 = vmatpush3.bf16.msra.mxu1 %v2030_v62  ;;  %v778_v20 = vmul.f32 0.7978846, %v762_v23  ;;  %v696_v57 = vmul.f32 0.5, %v2387_v24  ;;  %v690_v60 = vmul.f32 0.5, %v2377_v4 }
 0x16c   :  { %1913 = vmatprep.subr.bf16.mxu1 %v2032_v3  ;;  %2077 = vtanh.f32 %v768_v7  ;;  %v698_v61 = vmul.f32 0.5, %v2396_v42  ;;  %v2050_v3 = vld [vmem:[#allocation5 + $0x1b8] sm:$0xff]   ;;  %v2188_v4 = vmov 0.0|0.0   ;;  %v2190_v42 = vmov 0.0  }
 0x16d   :  { %1892 = vmatpush3.bf16.msra.mxu0 %v2033_v6  ;;  %2079 = vtanh.f32 %v776_v9 }
 0x16e   :  { %1893 = vmatprep.subr.bf16.mxu0 %v2035_v11  ;;  %2081 = vtanh.f32 %v770_v16  ;;  %v1768_v11 = vld [vmem:[%s2508_s4] ss:$0 sm:$0xff] }
 0x16f   :  { %1914 = vmatpush3.bf16.msra.mxu1 %v2034_v15  ;;  %2083 = vtanh.f32 %v778_v20 }
 0x170   :  { %1915 = vmatprep.subr.bf16.mxu1 %v2036_v17 }
 0x171   :  { %1894 = vmatpush3.bf16.msra.mxu0 %v2037_v21 }
 0x172   :  { %v2070_v27 = vpop.eup %2069  ;;  %1895 = vmatprep.subr.bf16.mxu0 %v2039_v25 }
 0x173   :  { %v2072_v34 = vpop.eup %2071  ;;  %1916 = vmatpush3.bf16.msra.mxu1 %v2038_v31  ;;  %v799_v41 = vadd.f32 1.0, %v2070_v27 }
 0x174   :  { %v2074_v43 = vpop.eup %2073  ;;  %1917 = vmatprep.subr.bf16.mxu1 %v2040_v32  ;;  %v801_v44 = vadd.f32 1.0, %v2072_v34 }
 0x175   :  { %v2076_v46 = vpop.eup %2075  ;;  %1896 = vmatpush3.bf16.msra.mxu0 %v2041_v26  ;;  %v807_v50 = vadd.f32 1.0, %v2074_v43  ;;  %v815_v56 = vmul.f32 %v799_v41, %v687_v48 }
 0x176   :  { %v2078_v51 = vpop.eup %2077  ;;  %1897 = vmatprep.subr.bf16.mxu0 %v2043_v33  ;;  %v809_v28 = vadd.f32 1.0, %v2076_v46  ;;  %v817_v59 = vmul.f32 %v801_v44, %v689_v18 }
 0x177   :  { %v2080_v53 = vpop.eup %2079  ;;  %1918 = vmatpush3.bf16.msra.mxu1 %v2042_v40  ;;  %v800_v19 = vadd.f32 1.0, %v2078_v51  ;;  %v823_v29 = vmul.f32 %v807_v50, %v695_v49 }
 0x178   :  { %v2082_v63 = vpop.eup %2081  ;;  %1919 = vmatprep.subr.bf16.mxu1 %v2044_v45  ;;  %v808_v58 = vadd.f32 1.0, %v2080_v53  ;;  %v825_v22 = vmul.f32 %v809_v28, %v697_v52 }
 0x179   :  { %v2084_v38 = vpop.eup %2083  ;;  %1898 = vmatpush3.bf16.msra.mxu0 %v2045_v47  ;;  %v802_v62 = vadd.f32 1.0, %v2082_v63  ;;  %v831_v39 = vpack.c.bf16 %v823_v29, %v815_v56  ;;  %v816_v1 = vmul.f32 %v800_v19, %v688_v55  ;;  %v1520_v29 = vmul.f32 %v2274_v35, %v2267_v13  ;;  %v1524_v13 = vld [vmem:[%s2509_s5 + $0x8] sm:$0xff] }
 0x17a   :  { %1899 = vmatprep.subr.bf16.mxu0 %v2047_v5  ;;  %v824_v2 = vmul.f32 %v808_v58, %v696_v57  ;;  %v810_v0 = vadd.f32 1.0, %v2084_v38  ;;  %v833_v8 = vpack.c.bf16 %v825_v22, %v817_v59  ;;  %v1523_v57 = vld [vmem:[%s2509_s5] sm:$0xff]  ;;  %v1525_v58 = vld [vmem:[%s2509_s5 + $0x10] sm:$0xff]  ;;  %v1526_v22 = vld [vmem:[%s2509_s5 + $0x18] sm:$0xff]  ;;  %v81_v38 = vmul.f32 %v2274_v35, %v2271_v30 }
 0x17b   :  { %1920 = vmatpush3.bf16.msra.mxu1 %v2046_v54  ;;  %v818_v6 = vmul.f32 %v802_v62, %v690_v60  ;;  %v1529_v59 = vld [vmem:[%s2509_s5 + $0x30] sm:$0xff] }
 0x17c   :  { %1921 = vmatprep.subr.bf16.mxu1 %v2048_v12  ;;  %v832_v24 = vpack.c.bf16 %v824_v2, %v816_v1  ;;  %v826_v7 = vmul.f32 %v810_v0, %v698_v61  ;;  %v1522_v12 = vsel %vm1521_vm1, 1.0, %v1520_v29 }
 0x17d   :  { %1900 = vmatpush3.bf16.msra.mxu0 %v2049_v14 }
 0x17e   :  { %1468 = vmatprep.mubr.bf16.mxu0 %v832_v24  ;;  %v834_v9 = vpack.c.bf16 %v826_v7, %v818_v6  ;;  %1966 = vmatprep.subr.bf16.mxu0 %v2188_v4 }
 0x17f   :  { %1922 = vmatpush3.bf16.msra.mxu1 %v2050_v3 }
 0x180   :  { %1509 = vmatprep.mubr.bf16.mxu1 %v834_v9  ;;  %1469 = vmatmul.mubr.bf16.vlgmr.msra.gmra.mrb[12].mxu0 %v831_v39 }
 0x181   :  { %1969 = vmatprep.subr.bf16.mxu1 %v2188_v4  ;;  %1945 = vmatprep.mubr.msk.f32.mxu0 %vm2189_vm0, %v2190_v42 }
 0x182   :  { %1510 = vmatmul.mubr.bf16.vlgmr.msra.gmra.mrb[12].mxu1 %v833_v8 }
 0x183   :  { %1957 = vmatprep.mubr.msk.f32.mxu1 %vm2189_vm0, %v2190_v42 }
 0x232   :  { %v1857_v10 = vpop.f32.mrb[8].mxu0 }
 0x233   :  { %v1858_v23 = vpop.f32.mrb[9].mxu0 }
 0x234   :  { %v1859_v15 = vadd.f32 %v1858_v23, %v1857_v10  ;;  %v1860_v16 = vpop.f32.mrb[10].mxu0 }
 0x235   :  { %v1879_v17 = vpop.f32.mrb[8].mxu1  ;;  %v1861_v20 = vpop.f32.mrb[11].mxu0 }
 0x236   :  { %v1389_v21 = vadd.f32 %v1859_v15, %v1768_v11  ;;  %v1880_v25 = vpop.f32.mrb[9].mxu1  ;;  %v1862_v31 = vadd.f32 %v1861_v20, %v1860_v16 }
 0x237   :  { %v1881_v32 = vadd.f32 %v1880_v25, %v1879_v17  ;;  %v1882_v26 = vpop.f32.mrb[10].mxu1 }
 0x238   :  { %v1392_v27 = vadd.f32 %v1862_v31, %v1768_v11  ;;  %v1883_v33 = vpop.f32.mrb[11].mxu1 }
 0x239   :  { %v1430_v34 = vadd.f32 %v1881_v32, %v1389_v21  ;;  %v1884_v40 = vadd.f32 %v1883_v33, %v1882_v26 }
 0x23b   :  { %v1433_v41 = vadd.f32 %v1884_v40, %v1392_v27 }
 0x253   :  { %v1901_v43 = vpop.f32.mrb[12].mxu0 }
 0x254   :  { %v1902_v45 = vpop.f32.mrb[13].mxu0 }
 0x255   :  { %v1923_v44 = vpop.f32.mrb[12].mxu1  ;;  %v1903_v46 = vadd.f32 %v1902_v45, %v1901_v43  ;;  %v1904_v47 = vpop.f32.mrb[14].mxu0 }
 0x256   :  { %v1924_v48 = vpop.f32.mrb[13].mxu1  ;;  %v1905_v49 = vpop.f32.mrb[15].mxu0 }
 0x257   :  { %v1471_v50 = vadd.f32 %v1903_v46, %v1430_v34  ;;  %v1925_v51 = vadd.f32 %v1924_v48, %v1923_v44  ;;  %v1926_v5 = vpop.f32.mrb[14].mxu1  ;;  %v1906_v18 = vadd.f32 %v1905_v49, %v1904_v47 }
 0x258   :  { %v1927_v52 = vpop.f32.mrb[15].mxu1 }
 0x259   :  { %v1512_v28 = vadd.f32 %v1925_v51, %v1471_v50  ;;  %v1474_v53 = vadd.f32 %v1906_v18, %v1433_v41  ;;  %v1928_v54 = vadd.f32 %v1927_v52, %v1926_v5 }
 0x25b   :  { %v1515_v55 = vadd.f32 %v1928_v54, %v1474_v53  ;;  %v1518_v19 = vadd.f32 %v1512_v28, %v2277_v36  ;;  %v1527_v36 = vld [vmem:[%s2509_s5 + $0x20] sm:$0xff] }
 0x25d   :  { %v1519_v56 = vadd.f32 %v1515_v55, %v2280_v37  ;;  %v1528_v37 = vld [vmem:[%s2509_s5 + $0x28] sm:$0xff]  ;;  %s2191_s5 = smov [#allocation7]  }
 0x25e   :  { %s1675_s23 = sshll.u32 %s2191_s5, 4  ;;  %s1676_s23 = int_to_ptr.vmem [resolvable:$true] %s1675_s23 }
 0x25f   :  { %v1967_v63 = vpack.c.bf16 %v1519_v56, %v1518_v19  ;;  %s2129_s25 = scalar_lea.vmem %s1676_s23, 384  ;;  %p2134_p3 = scmp.lt.s32.totalorder %s1676_s23, %s1676_s23 }
 0x260   :  { %p2130_p2 = scmp.ne.s32.totalorder %s1676_s23, %s2129_s25  ;;  %p2135_p4 = scmp.lt.s32.totalorder %s2129_s25, %s2129_s25 }
 0x261   :  { %1968 = vmatpush3.bf16.msra.mxu0 %v1967_v63  ;;  %1971 = vmatpush3.bf16.msra.mxu1 %v1967_v63 }
 0x262   :  { %1943 = vmatprep.subr.mxu0 %v2190_v42  ;;  %1970 = vmatprep.subr.mxu1 %v2190_v42  ;;  %p2136_p5 = por %p2135_p4, %p2134_p3 }
 0x264   :  { %p2137_p6 = pnand %p2136_p5, %p2130_p2 }
 0x265   :  { %1944 = vmatpush3.msk.msra.mxu0 %vm1552_vm2, %v1522_v12  ;;  %1972 = vmatpush3.msk.msra.mxu1 %vm1552_vm2, %v1522_v12 }
 0x266   :  { %1946 = vmatmul.mubr.msk.f32.vlgmr.msra.gmra.mrb[16].mxu0 %vm1530_vm3, %v1523_v57  ;;  %1958 = vmatmul.mubr.msk.f32.vlgmr.msra.gmra.mrb[16].mxu1 %vm1530_vm3, %v1527_v36 }
 0x267   :  { %1948 = vmatprep.mubr.msk.f32.mxu0 %vm2189_vm0, %v2190_v42  ;;  %1960 = vmatprep.mubr.msk.f32.mxu1 %vm2189_vm0, %v2190_v42 }
 0x26a   :  { %1949 = vmatmul.mubr.msk.f32.gmra.mrb[18].mxu0 %vm1530_vm3, %v1524_v13  ;;  %1961 = vmatmul.mubr.msk.f32.gmra.mrb[18].mxu1 %vm1530_vm3, %v1528_v37 }
 0x26b   :  { %1951 = vmatprep.mubr.msk.f32.mxu0 %vm2189_vm0, %v2190_v42  ;;  %1963 = vmatprep.mubr.msk.f32.mxu1 %vm2189_vm0, %v2190_v42 }
 0x26e   :  { %1952 = vmatmul.mubr.msk.f32.gmra.mrb[20].mxu0 %vm1530_vm3, %v1525_v58  ;;  %1964 = vmatmul.mubr.msk.f32.gmra.mrb[20].mxu1 %vm1530_vm3, %v1529_v59 }
 0x26f   :  { %1954 = vmatprep.mubr.msk.f32.mxu0 %vm2189_vm0, %v2190_v42 }
 0x272   :  { %1955 = vmatmul.mubr.msk.f32.gmra.mrb[22].mxu0 %vm1530_vm3, %v1526_v22 }
 0x339   :  { %v1622_v14 = vpop.f32.mrb[16].mxu0  ;;  %v1642_v60 = vpop.f32.mrb[16].mxu1 }
 0x33a   :  { %v1656_v61 = vmul.f32 %v1622_v14, %v81_v38  ;;  %v1947_v62 = vpop.f32.mrb[17].mxu0  ;;  %v1660_v39 = vmul.f32 %v1642_v60, %v81_v38  ;;  %v1959_v1 = vpop.f32.mrb[17].mxu1 }
 0x33c   :  { %1663 = vst [vmem:[#allocation7] sm:$0xff] %v1656_v61  ;;  %1667 = vst [vmem:[#allocation8 + $0x8] sm:$0xff] %v1660_v39 }
 0x33d   :  { %v1627_v2 = vpop.f32.mrb[18].mxu0  ;;  %v1647_v0 = vpop.f32.mrb[18].mxu1 }
 0x33e   :  { %v1657_v8 = vmul.f32 %v1627_v2, %v81_v38  ;;  %v1950_v3 = vpop.f32.mrb[19].mxu0  ;;  %v1661_v24 = vmul.f32 %v1647_v0, %v81_v38  ;;  %v1962_v6 = vpop.f32.mrb[19].mxu1 }
 0x340   :  { %1664 = vst [vmem:[#allocation7 + $0x8] sm:$0xff] %v1657_v8  ;;  %1668 = vst [vmem:[#allocation8 + $0x10] sm:$0xff] %v1661_v24 }
 0x341   :  { %v1632_v7 = vpop.f32.mrb[20].mxu0  ;;  %v1652_v30 = vpop.f32.mrb[20].mxu1 }
 0x342   :  { %v1658_v35 = vmul.f32 %v1632_v7, %v81_v38  ;;  %v1953_v9 = vpop.f32.mrb[21].mxu0  ;;  %v1662_v4 = vmul.f32 %v1652_v30, %v81_v38  ;;  %v1965_v42 = vpop.f32.mrb[21].mxu1 }
 0x344   :  { %1665 = vst [vmem:[#allocation7 + $0x10] sm:$0xff] %v1658_v35  ;;  %1669 = vst [vmem:[#allocation8 + $0x18] sm:$0xff] %v1662_v4 }
 0x345   :  { %v1637_v10 = vpop.f32.mrb[22].mxu0 }
 0x346   :  { %2140 = shalt.err (!%p2137_p6)
}
 0x347   :  { %s2141_s3 = scalar_lea.hbm %s2510_s6, 384 }
 0x348   :  { %p2142_p7 = scmp.ne.s32.totalorder %s2510_s6, %s2141_s3  ;;  %p2145_p8 = scmp.lt.u32.totalorder %s2141_s3, %s2510_s6 }
 0x34a   :  { %p2147_p9 = pnand %p2145_p8, %p2142_p7 }
 0x34c   :  { %2150 = shalt.err (!%p2147_p9)
}
 0x34d   :  { %s2193_s8 = smov 128   ;;  %s2194_s2 = smov 8   ;;  %v1659_v11 = vmul.f32 %v1637_v10, %v81_v38  ;;  %v1956_v23 = vpop.f32.mrb[23].mxu0 }
 0x34e   :  { %1681 = dma.vmem_to_hbm [thread:$0]  %s1676_s23, 384, %s2510_s6, [#allocation4], %s2193_s8, %s2193_s8, %s2194_s2  }
 0x34f   :  { %1666 = vst [vmem:[#allocation8] sm:$0xff] %v1659_v11  ;;  %s2151_s10 = scalar_lea.vmem %s1688_s1, 512  ;;  %p2156_p11 = scmp.lt.s32.totalorder %s1688_s1, %s1688_s1 }
 0x350   :  { %p2152_p10 = scmp.ne.s32.totalorder %s1688_s1, %s2151_s10  ;;  %p2157_p12 = scmp.lt.s32.totalorder %s2151_s10, %s2151_s10 }
 0x352   :  { %p2158_p13 = por %p2157_p12, %p2156_p11 }
 0x354   :  { %p2159_p0 = pnand %p2158_p13, %p2152_p10 }
 0x356   :  { %2162 = shalt.err (!%p2159_p0)
}
 0x357   :  { %s2163_s13 = scalar_lea.hbm %s2511_s7, 512 }
 0x358   :  { %p2164_p1 = scmp.ne.s32.totalorder %s2511_s7, %s2163_s13  ;;  %p2167_p2 = scmp.lt.u32.totalorder %s2163_s13, %s2511_s7 }
 0x35a   :  { %p2169_p3 = pnand %p2167_p2, %p2164_p1 }
 0x35c   :  { %2172 = shalt.err (!%p2169_p3)
}
 0x35d   :  { %1693 = dma.vmem_to_hbm [thread:$0]  %s1688_s1, 512, %s2511_s7, [#allocation9], %s2193_s8, %s2193_s8, %s2194_s2  }
 0x35e   :  { %2177 = dma.done.wait [#allocation4], 384  }
 0x35f   :  { %2178 = vsyncadd [#allocation4], 4294966912 }
 0x360   :  { %2179 = dma.done.wait [#allocation9], 512  }
 0x361   :  { %2180 = vsyncadd [#allocation9], 4294966784 }
 0x362   :  { %1700 = vsyncpa [#allocation3], 1 }
 0x363   :  { %1701 = vsyncpa [#allocation6], 1 }
 0x364   :  { %1702 = vsyncpa [#allocation4], 1 }
 0x365   :  { %1703 = vsyncpa [#allocation9], 1 }

// kernel: tpu_custom_call.1
= control target key start
LH: loop header
LB: loop body
LE: loop exit
PB: predicated region body
PF: predicated region fallthrough
CT: control target
= control target key end

     0   :  { %13 = vsyncpa [#allocation3], 0  ;;  %s2504_s0 = inlined_call_operand.vmem [shape: f32[16,128], index: 0, kind: input, shape index: {}]   ;;  %s2505_s1 = inlined_call_operand.hbm [shape: bf16[128,1024], index: 1, kind: input, shape index: {}]   ;;  %s2506_s2 = inlined_call_operand.vmem [shape: f32[1,1024], index: 2, kind: input, shape index: {}]   ;;  %s2507_s3 = inlined_call_operand.hbm [shape: bf16[1024,128], index: 3, kind: input, shape index: {}]   ;;  %s2508_s4 = inlined_call_operand.vmem [shape: f32[1,128], index: 4, kind: input, shape index: {}]   ;;  %s2509_s5 = inlined_call_operand.vmem [shape: f32[56,18], index: 5, kind: input, shape index: {}]   ;;  %s2510_s6 = inlined_call_operand.hbm [shape: f32[24,128], index: 6, kind: output, shape index: {0}]   ;;  %s2511_s7 = inlined_call_operand.hbm [shape: f32[32,128], index: 7, kind: output, shape index: {1}]  }
   0x1   :  { %14 = vsyncpa [#allocation6], 0 }
   0x2   :  { %15 = vsyncpa [#allocation4], 0 }
   0x3   :  { %16 = vsyncpa [#allocation9], 0  ;;  %s2181_s24 = smov [#allocation2]   ;;  %s2085_s28 = scalar_lea.hbm %s2505_s1, 8192 }
   0x4   :  { %s24_s25 = sshll.u32 %s2181_s24, 4  ;;  %p2086_p0 = scmp.ne.s32.totalorder %s2505_s1, %s2085_s28  ;;  %s25_s25 = int_to_ptr.vmem [resolvable:$true] %s24_s25 }
   0x5   :  { %p2089_p1 = scmp.lt.u32.totalorder %s2085_s28, %s2505_s1 }
   0x7   :  { %p2091_p2 = pnand %p2089_p1, %p2086_p0 }
   0x9   :  { %2094 = shalt.err (!%p2091_p2)
}
   0xa   :  { %s2095_s10 = scalar_lea.vmem %s25_s25, 8192  ;;  %p2100_p4 = scmp.lt.s32.totalorder %s25_s25, %s25_s25 }
   0xb   :  { %p2096_p3 = scmp.ne.s32.totalorder %s25_s25, %s2095_s10  ;;  %p2101_p5 = scmp.lt.s32.totalorder %s2095_s10, %s2095_s10 }
   0xd   :  { %p2102_p6 = por %p2101_p5, %p2100_p4 }
   0xf   :  { %p2103_p7 = pnand %p2102_p6, %p2096_p3 }
  0x11   :  { %2106 = shalt.err (!%p2103_p7)
}
  0x12   :  { %s2182_s11 = smov 512   ;;  %s2183_s12 = smov 32  }
  0x13   :  { %30 = dma.hbm_to_vmem [thread:$0]  %s2505_s1, 8192, %s25_s25, [#allocation3], %s2182_s11, %s2182_s11, %s2183_s12  }
  0x14   :  { %s2184_s15 = smov [#allocation5]   ;;  %s2107_s19 = scalar_lea.hbm %s2507_s3, 8192 }
  0x15   :  { %s38_s16 = sshll.u32 %s2184_s15, 4  ;;  %p2108_p8 = scmp.ne.s32.totalorder %s2507_s3, %s2107_s19  ;;  %s39_s16 = int_to_ptr.vmem [resolvable:$true] %s38_s16 }
  0x16   :  { %p2111_p9 = scmp.lt.u32.totalorder %s2107_s19, %s2507_s3 }
  0x18   :  { %p2113_p10 = pnand %p2111_p9, %p2108_p8 }
  0x1a   :  { %2116 = shalt.err (!%p2113_p10)
}
  0x1b   :  { %s2117_s24 = scalar_lea.vmem %s39_s16, 8192  ;;  %p2122_p12 = scmp.lt.s32.totalorder %s39_s16, %s39_s16 }
  0x1c   :  { %p2118_p11 = scmp.ne.s32.totalorder %s39_s16, %s2117_s24  ;;  %p2123_p13 = scmp.lt.s32.totalorder %s2117_s24, %s2117_s24 }
  0x1e   :  { %p2124_p0 = por %p2123_p13, %p2122_p12 }
  0x20   :  { %p2125_p1 = pnand %p2124_p0, %p2118_p11 }
  0x22   :  { %2128 = shalt.err (!%p2125_p1)
}
  0x23   :  { %s2185_s1 = smov 64   ;;  %s2186_s25 = smov 4  }
  0x24   :  { %44 = dma.hbm_to_vmem [thread:$0]  %s2507_s3, 8192, %s39_s16, [#allocation6], %s2185_s1, %s2185_s1, %s2186_s25  }
  0x25   :  { %2173 = dma.done.wait [#allocation3], 8192  }
  0x26   :  { %2174 = vsyncadd [#allocation3], 4294959104 }
  0x27   :  { %2175 = dma.done.wait [#allocation6], 8192  }
  0x28   :  { %2176 = vsyncadd [#allocation6], 4294959104  ;;  %v2187_v0 = vmov 0   ;;  %v85_v1 = vld [vmem:[#allocation2] sm:$0xff]  ;;  %v86_v3 = vld [vmem:[#allocation2 + $0x8] sm:$0xff]  ;;  %vm2189_vm0 = vmmov 0  }
  0x29   :  { %543 = vmatprep.mubr.bf16.mxu0 %v2187_v0  ;;  %586 = vmatprep.mubr.bf16.mxu1 %v2187_v0  ;;  %v89_v2 = vld [vmem:[#allocation2 + $0x20] sm:$0xff]  ;;  %v90_v5 = vld [vmem:[#allocation2 + $0x28] sm:$0xff]  ;;  %vm1521_vm1 = vcmask 1040384   ;;  %vm1552_vm2 = vcmask 1041408   ;;  %vm1530_vm3 = vcmask 146432   ;;  %s2192_s24 = smov [#allocation8]  }
  0x2a   :  { %v1705_v4 = vcombine.high %v85_v1, %v89_v2  ;;  %v1704_v6 = vcombine.low %v85_v1, %v89_v2  ;;  %v93_v7 = vld [vmem:[#allocation2 + $0x40] sm:$0xff]  ;;  %v1707_v9 = vcombine.high %v86_v3, %v90_v5  ;;  %v1706_v10 = vcombine.low %v86_v3, %v90_v5  ;;  %v94_v12 = vld [vmem:[#allocation2 + $0x48] sm:$0xff]  ;;  %v87_v5 = vld [vmem:[#allocation2 + $0x10] sm:$0xff]  ;;  %s1687_s1 = sshll.u32 %s2192_s24, 4  ;;  %s1688_s1 = int_to_ptr.vmem [resolvable:$true] %s1687_s1 }
  0x2b   :  { %v97_v8 = vld [vmem:[#allocation2 + $0x60] sm:$0xff]  ;;  %v98_v13 = vld [vmem:[#allocation2 + $0x68] sm:$0xff] }
  0x2c   :  { %v1713_v11 = vcombine.high %v93_v7, %v97_v8  ;;  %v101_v14 = vld [vmem:[#allocation2 + $0x80] sm:$0xff]  ;;  %511 = vmatprep.subr.bf16.mxu0 %v1705_v4  ;;  %v1715_v15 = vcombine.high %v94_v12, %v98_v13  ;;  %v102_v17 = vld [vmem:[#allocation2 + $0x88] sm:$0xff]  ;;  %554 = vmatprep.subr.bf16.mxu1 %v1707_v9  ;;  %v1712_v19 = vcombine.low %v93_v7, %v97_v8  ;;  %v88_v9 = vld [vmem:[#allocation2 + $0x18] sm:$0xff] }
  0x2d   :  { %v105_v16 = vld [vmem:[#allocation2 + $0xa0] sm:$0xff]  ;;  %v106_v18 = vld [vmem:[#allocation2 + $0xa8] sm:$0xff]  ;;  %512 = vmatpush1.bf16.msra.mxu0 %v1704_v6  ;;  %555 = vmatpush1.bf16.msra.mxu1 %v1706_v10  ;;  %v1714_v20 = vcombine.low %v94_v12, %v98_v13  ;;  %v91_v6 = vld [vmem:[#allocation2 + $0x30] sm:$0xff] }
  0x2e   :  { %513 = vmatprep.subr.bf16.mxu0 %v1713_v11  ;;  %v1721_v21 = vcombine.high %v101_v14, %v105_v16  ;;  %556 = vmatprep.subr.bf16.mxu1 %v1715_v15  ;;  %v1723_v22 = vcombine.high %v102_v17, %v106_v18  ;;  %v109_v23 = vld [vmem:[#allocation2 + $0xc0] sm:$0xff]  ;;  %v110_v25 = vld [vmem:[#allocation2 + $0xc8] sm:$0xff]  ;;  %v1720_v27 = vcombine.low %v101_v14, %v105_v16  ;;  %v92_v12 = vld [vmem:[#allocation2 + $0x38] sm:$0xff] }
  0x2f   :  { %v113_v24 = vld [vmem:[#allocation2 + $0xe0] sm:$0xff]  ;;  %v114_v26 = vld [vmem:[#allocation2 + $0xe8] sm:$0xff]  ;;  %v1722_v28 = vcombine.low %v102_v17, %v106_v18  ;;  %v1709_v16 = vcombine.high %v87_v5, %v91_v6 }
  0x30   :  { %v1729_v29 = vcombine.high %v109_v23, %v113_v24  ;;  %v1731_v30 = vcombine.high %v110_v25, %v114_v26  ;;  %v117_v31 = vld [vmem:[#allocation2 + $0x100] sm:$0xff]  ;;  %v118_v33 = vld [vmem:[#allocation2 + $0x108] sm:$0xff]  ;;  %v1728_v35 = vcombine.low %v109_v23, %v113_v24  ;;  %v1730_v38 = vcombine.low %v110_v25, %v114_v26 }
  0x31   :  { %514 = vmatpush1.bf16.msra.mxu0 %v1712_v19  ;;  %557 = vmatpush1.bf16.msra.mxu1 %v1714_v20  ;;  %v121_v32 = vld [vmem:[#allocation2 + $0x120] sm:$0xff]  ;;  %v122_v34 = vld [vmem:[#allocation2 + $0x128] sm:$0xff]  ;;  %v1711_v19 = vcombine.high %v88_v9, %v92_v12 }
  0x32   :  { %515 = vmatprep.subr.bf16.mxu0 %v1721_v21  ;;  %558 = vmatprep.subr.bf16.mxu1 %v1723_v22  ;;  %v56_v36 = vld [vmem:[%s2504_s0] sm:$0xff]  ;;  %v57_v37 = vld [vmem:[%s2504_s0 + $0x8] sm:$0xff]  ;;  %v1737_v39 = vcombine.high %v117_v31, %v121_v32  ;;  %v1739_v41 = vcombine.high %v118_v33, %v122_v34  ;;  %v1736_v47 = vcombine.low %v117_v31, %v121_v32  ;;  %v95_v31 = vld [vmem:[#allocation2 + $0x50] sm:$0xff] }
  0x33   :  { %v58_v40 = vadd.f32 %v57_v37, %v56_v36  ;;  %v125_v42 = vld [vmem:[#allocation2 + $0x140] sm:$0xff]  ;;  %v126_v44 = vld [vmem:[#allocation2 + $0x148] sm:$0xff]  ;;  %v1738_v48 = vcombine.low %v118_v33, %v122_v34  ;;  %v99_v32 = vld [vmem:[#allocation2 + $0x70] sm:$0xff] }
  0x34   :  { %v129_v43 = vld [vmem:[#allocation2 + $0x160] sm:$0xff]  ;;  %v130_v45 = vld [vmem:[#allocation2 + $0x168] sm:$0xff]  ;;  %v96_v33 = vld [vmem:[#allocation2 + $0x58] sm:$0xff] }
  0x35   :  { %516 = vmatpush1.bf16.msra.mxu0 %v1720_v27  ;;  %559 = vmatpush1.bf16.msra.mxu1 %v1722_v28  ;;  %v59_v46 = vrot.slane %v58_v40, 4  ;;  %v1745_v49 = vcombine.high %v125_v42, %v129_v43  ;;  %v1747_v51 = vcombine.high %v126_v44, %v130_v45  ;;  %v133_v52 = vld [vmem:[#allocation2 + $0x180] sm:$0xff]  ;;  %v134_v54 = vld [vmem:[#allocation2 + $0x188] sm:$0xff]  ;;  %v1744_v57 = vcombine.low %v125_v42, %v129_v43  ;;  %v100_v34 = vld [vmem:[#allocation2 + $0x78] sm:$0xff] }
  0x36   :  { %517 = vmatprep.subr.bf16.mxu0 %v1729_v29  ;;  %560 = vmatprep.subr.bf16.mxu1 %v1731_v30  ;;  %v137_v53 = vld [vmem:[#allocation2 + $0x1a0] sm:$0xff]  ;;  %v138_v55 = vld [vmem:[#allocation2 + $0x1a8] sm:$0xff]  ;;  %v1746_v58 = vcombine.low %v126_v44, %v130_v45  ;;  %v104_v42 = vld [vmem:[#allocation2 + $0x98] sm:$0xff]  ;;  %v1717_v45 = vcombine.high %v95_v31, %v99_v32 }
  0x37   :  { %v60_v50 = vadd.f32 %v59_v46, %v58_v40  ;;  %v1753_v59 = vcombine.high %v133_v52, %v137_v53  ;;  %v141_v60 = vld [vmem:[#allocation2 + $0x1c0] sm:$0xff]  ;;  %v1755_v63 = vcombine.high %v134_v54, %v138_v55  ;;  %v142_v1 = vld [vmem:[#allocation2 + $0x1c8] sm:$0xff]  ;;  %v1752_v4 = vcombine.low %v133_v52, %v137_v53  ;;  %v103_v40 = vld [vmem:[#allocation2 + $0x90] sm:$0xff] }
  0x38   :  { %v145_v61 = vld [vmem:[#allocation2 + $0x1e0] sm:$0xff]  ;;  %v146_v2 = vld [vmem:[#allocation2 + $0x1e8] sm:$0xff]  ;;  %v1754_v7 = vcombine.low %v134_v54, %v138_v55  ;;  %v108_v43 = vld [vmem:[#allocation2 + $0xb8] sm:$0xff]  ;;  %v1719_v46 = vcombine.high %v96_v33, %v100_v34 }
  0x39   :  { %518 = vmatpush1.bf16.msra.mxu0 %v1728_v35  ;;  %561 = vmatpush1.bf16.msra.mxu1 %v1730_v38  ;;  %v61_v56 = vrot.slane %v60_v50, 2  ;;  %v1761_v8 = vcombine.high %v141_v60, %v145_v61  ;;  %v1763_v11 = vcombine.high %v142_v1, %v146_v2  ;;  %v1760_v14 = vcombine.low %v141_v60, %v145_v61  ;;  %v115_v52 = vld [vmem:[#allocation2 + $0xf0] sm:$0xff]  ;;  %v112_v53 = vld [vmem:[#allocation2 + $0xd8] sm:$0xff] }
  0x3a   :  { %519 = vmatprep.subr.bf16.mxu0 %v1737_v39  ;;  %562 = vmatprep.subr.bf16.mxu1 %v1739_v41  ;;  %v1762_v15 = vcombine.low %v142_v1, %v146_v2  ;;  %v1708_v38 = vcombine.low %v87_v5, %v91_v6  ;;  %v1710_v39 = vcombine.low %v88_v9, %v92_v12  ;;  %v107_v41 = vld [vmem:[#allocation2 + $0xb0] sm:$0xff]  ;;  %v116_v54 = vld [vmem:[#allocation2 + $0xf8] sm:$0xff] }
  0x3b   :  { %v62_v62 = vadd.f32 %v61_v56, %v60_v50  ;;  %v1727_v50 = vcombine.high %v104_v42, %v108_v43  ;;  %v1724_v55 = vcombine.low %v103_v40, %v107_v41  ;;  %v1726_v56 = vcombine.low %v104_v42, %v108_v43  ;;  %v123_v60 = vld [vmem:[#allocation2 + $0x130] sm:$0xff]  ;;  %v120_v61 = vld [vmem:[#allocation2 + $0x118] sm:$0xff] }
  0x3c   :  { %v1734_v1 = vcombine.low %v112_v53, %v116_v54  ;;  %v128_v5 = vld [vmem:[#allocation2 + $0x158] sm:$0xff]  ;;  %v139_v12 = vld [vmem:[#allocation2 + $0x1b0] sm:$0xff] }
  0x3d   :  { %520 = vmatpush1.bf16.msra.mxu0 %v1736_v47  ;;  %563 = vmatpush1.bf16.msra.mxu1 %v1738_v48  ;;  %v63_v3 = vrot.slane %v62_v62, 1  ;;  %v1716_v47 = vcombine.low %v95_v31, %v99_v32  ;;  %v1718_v48 = vcombine.low %v96_v33, %v100_v34  ;;  %v132_v6 = vld [vmem:[#allocation2 + $0x178] sm:$0xff]  ;;  %v1987_v31 = vld [vmem:[#allocation5 + $0x40] sm:$0xff]   ;;  %v1995_v42 = vld [vmem:[#allocation5 + $0x50] sm:$0xff]  }
  0x3e   :  { %521 = vmatprep.subr.bf16.mxu0 %v1745_v49  ;;  %564 = vmatprep.subr.bf16.mxu1 %v1747_v51  ;;  %v1725_v49 = vcombine.high %v103_v40, %v107_v41  ;;  %v111_v51 = vld [vmem:[#allocation2 + $0xd0] sm:$0xff]  ;;  %v1988_v32 = vld [vmem:[#allocation5 + $0xc0] sm:$0xff]   ;;  %v1993_v40 = vld [vmem:[#allocation5 + $0x8] sm:$0xff]  }
  0x3f   :  { %v64_v10 = vadd.f32 %v63_v3, %v62_v62  ;;  %v124_v62 = vld [vmem:[#allocation2 + $0x138] sm:$0xff]  ;;  %v127_v3 = vld [vmem:[#allocation2 + $0x150] sm:$0xff]  ;;  %v1989_v33 = vld [vmem:[#allocation5] sm:$0xff]  }
  0x40   :  { %v1990_v34 = vld [vmem:[#allocation5 + $0x80] sm:$0xff]   ;;  %v1994_v41 = vld [vmem:[#allocation5 + $0x88] sm:$0xff]   ;;  %v1996_v43 = vld [vmem:[#allocation5 + $0xd0] sm:$0xff]  }
  0x41   :  { %522 = vmatpush1.bf16.msra.mxu0 %v1744_v57  ;;  %565 = vmatpush1.bf16.msra.mxu1 %v1746_v58  ;;  %v2267_v13 = vmul.f32 0.0625, %v64_v10  ;;  %v1733_v57 = vcombine.high %v111_v51, %v115_v52  ;;  %v1735_v58 = vcombine.high %v112_v53, %v116_v54  ;;  %v1751_v10 = vcombine.high %v128_v5, %v132_v6  ;;  %v2006_v53 = vld [vmem:[#allocation5 + $0xa0] sm:$0xff]   ;;  %v2007_v54 = vld [vmem:[#allocation5 + $0x68] sm:$0xff]  }
  0x42   :  { %523 = vmatprep.subr.bf16.mxu0 %v1753_v59  ;;  %566 = vmatprep.subr.bf16.mxu1 %v1755_v63  ;;  %v119_v59 = vld [vmem:[#allocation2 + $0x110] sm:$0xff]  ;;  %v1732_v63 = vcombine.low %v111_v51, %v115_v52  ;;  %v2004_v51 = vld [vmem:[#allocation5 + $0xe0] sm:$0xff]  }
  0x43   :  { %v67_v17 = vsub.f32 %v56_v36, %v2267_v13  ;;  %v68_v18 = vsub.f32 %v57_v37, %v2267_v13  ;;  %v1741_v2 = vcombine.high %v119_v59, %v123_v60  ;;  %v2005_v52 = vld [vmem:[#allocation5 + $0x20] sm:$0xff]  }
  0x45   :  { %524 = vmatpush1.bf16.msra.mxu0 %v1752_v4  ;;  %567 = vmatpush1.bf16.msra.mxu1 %v1754_v7  ;;  %v69_v20 = vmul.f32 %v67_v17, %v67_v17  ;;  %v70_v21 = vmul.f32 %v68_v18, %v68_v18  ;;  %v131_v4 = vld [vmem:[#allocation2 + $0x170] sm:$0xff]  ;;  %v1740_v7 = vcombine.low %v119_v59, %v123_v60 }
  0x46   :  { %525 = vmatprep.subr.bf16.mxu0 %v1761_v8  ;;  %568 = vmatprep.subr.bf16.mxu1 %v1763_v11  ;;  %v1742_v8 = vcombine.low %v120_v61, %v124_v62  ;;  %v1749_v9 = vcombine.high %v127_v3, %v131_v4  ;;  %v135_v11 = vld [vmem:[#allocation2 + $0x190] sm:$0xff] }
  0x47   :  { %v71_v22 = vadd.f32 %v70_v21, %v69_v20  ;;  %v143_v20 = vld [vmem:[#allocation2 + $0x1d0] sm:$0xff] }
  0x48   :  { %v147_v21 = vld [vmem:[#allocation2 + $0x1f0] sm:$0xff] }
  0x49   :  { %526 = vmatpush1.bf16.msra.mxu0 %v1760_v14  ;;  %569 = vmatpush1.bf16.msra.mxu1 %v1762_v15  ;;  %v72_v23 = vrot.slane %v71_v22, 4  ;;  %v136_v14 = vld [vmem:[#allocation2 + $0x198] sm:$0xff]  ;;  %v2012_v59 = vld [vmem:[#allocation5 + $0xf0] sm:$0xff]  }
  0x4a   :  { %597 = vmatprep.subr.bf16.mxu0 %v1709_v16  ;;  %640 = vmatprep.subr.bf16.mxu1 %v1711_v19  ;;  %v140_v15 = vld [vmem:[#allocation2 + $0x1b8] sm:$0xff]  ;;  %v1748_v16 = vcombine.low %v127_v3, %v131_v4  ;;  %v2013_v60 = vld [vmem:[#allocation5 + $0x30] sm:$0xff]   ;;  %v2020_v3 = vld [vmem:[#allocation5 + $0x1c0] sm:$0xff]   ;;  %v151_v4 = vlaneseq }
  0x4b   :  { %v73_v24 = vadd.f32 %v72_v23, %v71_v22  ;;  %v1759_v19 = vcombine.high %v136_v14, %v140_v15  ;;  %v144_v22 = vld [vmem:[#allocation2 + $0x1d8] sm:$0xff] }
  0x4c   :  { %v148_v23 = vld [vmem:[#allocation2 + $0x1f8] sm:$0xff] }
  0x4d   :  { %v74_v25 = vrot.slane %v73_v24, 2 }
  0x4f   :  { %v75_v26 = vadd.f32 %v74_v25, %v73_v24  ;;  %v1756_v24 = vcombine.low %v135_v11, %v139_v12  ;;  %v1758_v25 = vcombine.low %v136_v14, %v140_v15 }
  0x51   :  { %v76_v27 = vrot.slane %v75_v26, 1 }
  0x53   :  { %v77_v28 = vadd.f32 %v76_v27, %v75_v26  ;;  %v1765_v26 = vcombine.high %v143_v20, %v147_v21  ;;  %v1767_v27 = vcombine.high %v144_v22, %v148_v23 }
  0x55   :  { %v78_v29 = vmul.f32 0.06666667, %v77_v28  ;;  %v1764_v28 = vcombine.low %v143_v20, %v147_v21 }
  0x57   :  { %v2271_v30 = vadd.f32 1e-05, %v78_v29  ;;  %v1766_v29 = vcombine.low %v144_v22, %v148_v23 }
  0x59   :  { %2051 = vrsqrt.f32 %v2271_v30 }
  0x63   :  { %v2274_v35 = vpop.eup %2051 }
  0x64   :  { %v2277_v36 = vmul.f32 %v2274_v35, %v67_v17  ;;  %v2280_v37 = vmul.f32 %v2274_v35, %v68_v18  ;;  %v1750_v17 = vcombine.low %v128_v5, %v132_v6  ;;  %v1757_v18 = vcombine.high %v135_v11, %v139_v12 }
  0x65   :  { %v2292_v5 = vshrl.u32 %v151_v4, 7 }
  0x66   :  { %v2284_v44 = vpack.c.bf16 %v2280_v37, %v2277_v36 }
  0x67   :  { %v153_v6 = vsub.s32 0, %v2292_v5 }
  0x68   :  { %544 = vmatmul.mubr.bf16.vlgmr.msra.gmra.mrb[0].mxu0 %v2284_v44  ;;  %587 = vmatmul.mubr.bf16.vlgmr.msra.gmra.mrb[0].mxu1 %v2284_v44 }
  0x69   :  { %598 = vmatpush1.bf16.msra.mxu0 %v1708_v38  ;;  %641 = vmatpush1.bf16.msra.mxu1 %v1710_v39  ;;  %v1991_v38 = vld [vmem:[#allocation5 + $0x48] sm:$0xff]  }
  0x6a   :  { %599 = vmatprep.subr.bf16.mxu0 %v1717_v45  ;;  %642 = vmatprep.subr.bf16.mxu1 %v1719_v46  ;;  %v1992_v39 = vld [vmem:[#allocation5 + $0xc8] sm:$0xff]   ;;  %v1997_v45 = vld [vmem:[#allocation5 + $0x10] sm:$0xff]   ;;  %v1999_v46 = vld [vmem:[#allocation5 + $0x58] sm:$0xff]  }
  0x6b   :  { %629 = vmatprep.mubr.bf16.mxu0 %v2187_v0  ;;  %672 = vmatprep.mubr.bf16.mxu1 %v2187_v0  ;;  %v1743_v0 = vcombine.high %v120_v61, %v124_v62  ;;  %v2014_v61 = vld [vmem:[#allocation5 + $0xb0] sm:$0xff]   ;;  %v2015_v62 = vld [vmem:[#allocation5 + $0x78] sm:$0xff]  }
  0x6d   :  { %600 = vmatpush1.bf16.msra.mxu0 %v1716_v47  ;;  %643 = vmatpush1.bf16.msra.mxu1 %v1718_v48  ;;  %v2000_v47 = vld [vmem:[#allocation5 + $0xd8] sm:$0xff]  }
  0x6e   :  { %601 = vmatprep.subr.bf16.mxu0 %v1725_v49  ;;  %644 = vmatprep.subr.bf16.mxu1 %v1727_v50  ;;  %v2001_v48 = vld [vmem:[#allocation5 + $0x18] sm:$0xff]   ;;  %v2003_v50 = vld [vmem:[#allocation5 + $0x60] sm:$0xff]  }
  0x6f   :  { %v2002_v49 = vld [vmem:[#allocation5 + $0x98] sm:$0xff]  }
  0x71   :  { %602 = vmatpush1.bf16.msra.mxu0 %v1724_v55  ;;  %645 = vmatpush1.bf16.msra.mxu1 %v1726_v56  ;;  %v2008_v55 = vld [vmem:[#allocation5 + $0xe8] sm:$0xff]  }
  0x72   :  { %603 = vmatprep.subr.bf16.mxu0 %v1733_v57  ;;  %646 = vmatprep.subr.bf16.mxu1 %v1735_v58  ;;  %v2009_v56 = vld [vmem:[#allocation5 + $0x28] sm:$0xff]   ;;  %v2011_v58 = vld [vmem:[#allocation5 + $0x70] sm:$0xff]  }
  0x73   :  { %v2010_v57 = vld [vmem:[#allocation5 + $0xa8] sm:$0xff]  }
  0x75   :  { %604 = vmatpush1.bf16.msra.mxu0 %v1732_v63  ;;  %647 = vmatpush1.bf16.msra.mxu1 %v1734_v1  ;;  %v2016_v63 = vld [vmem:[#allocation5 + $0xf8] sm:$0xff]  }
  0x76   :  { %605 = vmatprep.subr.bf16.mxu0 %v1741_v2  ;;  %648 = vmatprep.subr.bf16.mxu1 %v1743_v0  ;;  %v2017_v1 = vld [vmem:[#allocation5 + $0x38] sm:$0xff]   ;;  %v2019_v0 = vld [vmem:[#allocation5 + $0x140] sm:$0xff]  }
  0x77   :  { %v2018_v2 = vld [vmem:[#allocation5 + $0xb8] sm:$0xff]  }
  0x79   :  { %606 = vmatpush1.bf16.msra.mxu0 %v1740_v7  ;;  %649 = vmatpush1.bf16.msra.mxu1 %v1742_v8  ;;  %v161_v7 = vsub.s32 2, %v2292_v5  ;;  %v2299_v8 = vld [vmem:[%s2506_s2] sm:$0xff] }
  0x7a   :  { %607 = vmatprep.subr.bf16.mxu0 %v1749_v9  ;;  %650 = vmatprep.subr.bf16.mxu1 %v1751_v10  ;;  %v157_v9 = vsub.s32 1, %v2292_v5  ;;  %v165_v10 = vsub.s32 3, %v2292_v5  ;;  %v154_v11 = vrot.slane %v2299_v8, %v153_v6 }
  0x7b   :  { %v162_v12 = vrot.slane %v2299_v8, %v161_v7 }
  0x7c   :  { %v158_v14 = vrot.slane %v2299_v8, %v157_v9  ;;  %v166_v15 = vrot.slane %v2299_v8, %v165_v10 }
  0x7d   :  { %608 = vmatpush1.bf16.msra.mxu0 %v1748_v16  ;;  %651 = vmatpush1.bf16.msra.mxu1 %v1750_v17 }
  0x7e   :  { %609 = vmatprep.subr.bf16.mxu0 %v1757_v18  ;;  %652 = vmatprep.subr.bf16.mxu1 %v1759_v19 }
  0x81   :  { %610 = vmatpush1.bf16.msra.mxu0 %v1756_v24  ;;  %653 = vmatpush1.bf16.msra.mxu1 %v1758_v25 }
  0x82   :  { %611 = vmatprep.subr.bf16.mxu0 %v1765_v26  ;;  %654 = vmatprep.subr.bf16.mxu1 %v1767_v27 }
  0x85   :  { %612 = vmatpush1.bf16.msra.mxu0 %v1764_v28  ;;  %655 = vmatpush1.bf16.msra.mxu1 %v1766_v29 }
  0x86   :  { %1841 = vmatprep.subr.bf16.mxu0 %v1987_v31  ;;  %1863 = vmatprep.subr.bf16.mxu1 %v1988_v32 }
  0x88   :  { %630 = vmatmul.mubr.bf16.vlgmr.msra.gmra.mrb[4].mxu0 %v2284_v44  ;;  %673 = vmatmul.mubr.bf16.vlgmr.msra.gmra.mrb[4].mxu1 %v2284_v44  ;;  %v1998_v44 = vld [vmem:[#allocation5 + $0x90] sm:$0xff]  }
  0x89   :  { %1842 = vmatpush3.bf16.msra.mxu0 %v1989_v33  ;;  %1864 = vmatpush3.bf16.msra.mxu1 %v1990_v34 }
  0x8a   :  { %1843 = vmatprep.subr.bf16.mxu0 %v1991_v38  ;;  %1865 = vmatprep.subr.bf16.mxu1 %v1992_v39 }
  0x8d   :  { %1844 = vmatpush3.bf16.msra.mxu0 %v1993_v40  ;;  %1866 = vmatpush3.bf16.msra.mxu1 %v1994_v41 }
  0x8e   :  { %1845 = vmatprep.subr.bf16.mxu0 %v1995_v42  ;;  %1867 = vmatprep.subr.bf16.mxu1 %v1996_v43 }
  0x91   :  { %1846 = vmatpush3.bf16.msra.mxu0 %v1997_v45  ;;  %1868 = vmatpush3.bf16.msra.mxu1 %v1998_v44 }
  0x92   :  { %1847 = vmatprep.subr.bf16.mxu0 %v1999_v46  ;;  %1869 = vmatprep.subr.bf16.mxu1 %v2000_v47 }
  0x95   :  { %1848 = vmatpush3.bf16.msra.mxu0 %v2001_v48  ;;  %1870 = vmatpush3.bf16.msra.mxu1 %v2002_v49 }
  0x96   :  { %1849 = vmatprep.subr.bf16.mxu0 %v2003_v50  ;;  %1871 = vmatprep.subr.bf16.mxu1 %v2004_v51 }
  0x99   :  { %1850 = vmatpush3.bf16.msra.mxu0 %v2005_v52  ;;  %1872 = vmatpush3.bf16.msra.mxu1 %v2006_v53 }
  0x9a   :  { %1851 = vmatprep.subr.bf16.mxu0 %v2007_v54  ;;  %1873 = vmatprep.subr.bf16.mxu1 %v2008_v55 }
  0x9d   :  { %1852 = vmatpush3.bf16.msra.mxu0 %v2009_v56  ;;  %1874 = vmatpush3.bf16.msra.mxu1 %v2010_v57 }
  0x9e   :  { %1853 = vmatprep.subr.bf16.mxu0 %v2011_v58  ;;  %1875 = vmatprep.subr.bf16.mxu1 %v2012_v59 }
  0xa1   :  { %1854 = vmatpush3.bf16.msra.mxu0 %v2013_v60  ;;  %1876 = vmatpush3.bf16.msra.mxu1 %v2014_v61 }
  0xa2   :  { %1855 = vmatprep.subr.bf16.mxu0 %v2015_v62  ;;  %1877 = vmatprep.subr.bf16.mxu1 %v2016_v63 }
  0xa5   :  { %1856 = vmatpush3.bf16.msra.mxu0 %v2017_v1  ;;  %1878 = vmatpush3.bf16.msra.mxu1 %v2018_v2 }
  0xa6   :  { %1885 = vmatprep.subr.bf16.mxu0 %v2019_v0  ;;  %1907 = vmatprep.subr.bf16.mxu1 %v2020_v3 }
 0x13b   :  { %v545_v16 = vpop.f32.mrb[0].mxu0  ;;  %v588_v17 = vpop.f32.mrb[0].mxu1 }
 0x13c   :  { %v2307_v18 = vadd.f32 %v545_v16, %v154_v11  ;;  %v2309_v19 = vadd.f32 %v588_v17, %v162_v12  ;;  %v547_v20 = vpop.f32.mrb[1].mxu0  ;;  %v590_v21 = vpop.f32.mrb[1].mxu1  ;;  %v177_v16 = vsub.s32 6, %v2292_v5 }
 0x13d   :  { %v2311_v22 = vadd.f32 %v547_v20, %v158_v14  ;;  %v2313_v23 = vadd.f32 %v590_v21, %v166_v15  ;;  %v549_v24 = vpop.f32.mrb[2].mxu0  ;;  %v592_v25 = vpop.f32.mrb[2].mxu1  ;;  %v173_v20 = vsub.s32 5, %v2292_v5 }
 0x13e   :  { %v699_v26 = vmul.f32 0.044715, %v2307_v18  ;;  %v701_v27 = vmul.f32 0.044715, %v2309_v19  ;;  %v2317_v28 = vadd.f32 %v549_v24, %v154_v11  ;;  %v2319_v29 = vadd.f32 %v592_v25, %v162_v12  ;;  %v551_v31 = vpop.f32.mrb[3].mxu0  ;;  %v594_v32 = vpop.f32.mrb[3].mxu1 }
 0x13f   :  { %v700_v33 = vmul.f32 0.044715, %v2311_v22  ;;  %v702_v34 = vmul.f32 0.044715, %v2313_v23  ;;  %v2323_v38 = vadd.f32 %v551_v31, %v158_v14  ;;  %v2325_v39 = vadd.f32 %v594_v32, %v166_v15 }
 0x140   :  { %v715_v40 = vmul.f32 %v699_v26, %v2307_v18  ;;  %v717_v41 = vmul.f32 %v701_v27, %v2309_v19  ;;  %v707_v42 = vmul.f32 0.044715, %v2317_v28  ;;  %v709_v43 = vmul.f32 0.044715, %v2319_v29 }
 0x141   :  { %v716_v45 = vmul.f32 %v700_v33, %v2311_v22  ;;  %v718_v44 = vmul.f32 %v702_v34, %v2313_v23  ;;  %v708_v46 = vmul.f32 0.044715, %v2323_v38  ;;  %v710_v47 = vmul.f32 0.044715, %v2325_v39 }
 0x142   :  { %v731_v48 = vmul.f32 %v715_v40, %v2307_v18  ;;  %v733_v49 = vmul.f32 %v717_v41, %v2309_v19  ;;  %v723_v50 = vmul.f32 %v707_v42, %v2317_v28  ;;  %v725_v51 = vmul.f32 %v709_v43, %v2319_v29 }
 0x143   :  { %v732_v52 = vmul.f32 %v716_v45, %v2311_v22  ;;  %v734_v53 = vmul.f32 %v718_v44, %v2313_v23  ;;  %v724_v54 = vmul.f32 %v708_v46, %v2323_v38  ;;  %v726_v55 = vmul.f32 %v710_v47, %v2325_v39 }
 0x144   :  { %v747_v56 = vadd.f32 %v731_v48, %v2307_v18  ;;  %v749_v57 = vadd.f32 %v733_v49, %v2309_v19  ;;  %v739_v58 = vmul.f32 %v723_v50, %v2317_v28  ;;  %v741_v59 = vmul.f32 %v725_v51, %v2319_v29 }
 0x145   :  { %v740_v60 = vmul.f32 %v724_v54, %v2323_v38  ;;  %v742_v61 = vmul.f32 %v726_v55, %v2325_v39  ;;  %v748_v0 = vadd.f32 %v732_v52, %v2311_v22  ;;  %v750_v7 = vadd.f32 %v734_v53, %v2313_v23 }
 0x146   :  { %v763_v62 = vmul.f32 0.7978846, %v747_v56  ;;  %v765_v63 = vmul.f32 0.7978846, %v749_v57  ;;  %v755_v1 = vadd.f32 %v739_v58, %v2317_v28  ;;  %v757_v2 = vadd.f32 %v741_v59, %v2319_v29 }
 0x147   :  { %v756_v3 = vadd.f32 %v740_v60, %v2323_v38  ;;  %v764_v9 = vmul.f32 0.7978846, %v748_v0  ;;  %v758_v11 = vadd.f32 %v742_v61, %v2325_v39  ;;  %v766_v12 = vmul.f32 0.7978846, %v750_v7 }
 0x148   :  { %2053 = vtanh.f32 %v763_v62  ;;  %v771_v4 = vmul.f32 0.7978846, %v755_v1  ;;  %v773_v6 = vmul.f32 0.7978846, %v757_v2  ;;  %v169_v15 = vsub.s32 4, %v2292_v5 }
 0x149   :  { %2055 = vtanh.f32 %v765_v63  ;;  %v772_v10 = vmul.f32 0.7978846, %v756_v3  ;;  %v774_v14 = vmul.f32 0.7978846, %v758_v11  ;;  %v178_v27 = vrot.slane %v2299_v8, %v177_v16  ;;  %v2021_v3 = vld [vmem:[#allocation5 + $0x100] sm:$0xff]  }
 0x14a   :  { %2057 = vtanh.f32 %v771_v4  ;;  %v170_v26 = vrot.slane %v2299_v8, %v169_v15  ;;  %v181_v33 = vsub.s32 7, %v2292_v5  ;;  %v683_v34 = vmul.f32 0.5, %v2307_v18 }
 0x14b   :  { %2059 = vtanh.f32 %v773_v6  ;;  %v691_v40 = vmul.f32 0.5, %v2317_v28  ;;  %v174_v43 = vrot.slane %v2299_v8, %v173_v20  ;;  %v685_v45 = vmul.f32 0.5, %v2309_v19 }
 0x14c   :  { %2061 = vtanh.f32 %v764_v9  ;;  %v693_v44 = vmul.f32 0.5, %v2319_v29  ;;  %v684_v48 = vmul.f32 0.5, %v2311_v22  ;;  %v692_v18 = vmul.f32 0.5, %v2323_v38 }
 0x14d   :  { %2063 = vtanh.f32 %v772_v10  ;;  %v182_v55 = vrot.slane %v2299_v8, %v181_v33  ;;  %v694_v19 = vmul.f32 0.5, %v2325_v39  ;;  %v686_v62 = vmul.f32 0.5, %v2313_v23  ;;  %v2023_v10 = vld [vmem:[#allocation5 + $0x148] sm:$0xff]  }
 0x14e   :  { %2065 = vtanh.f32 %v766_v12  ;;  %v2024_v33 = vld [vmem:[#allocation5 + $0x1c8] sm:$0xff]  }
 0x14f   :  { %2067 = vtanh.f32 %v774_v14 }
 0x152   :  { %v2054_v17 = vpop.eup %2053 }
 0x153   :  { %v2056_v21 = vpop.eup %2055  ;;  %v795_v24 = vadd.f32 1.0, %v2054_v17 }
 0x154   :  { %v2058_v25 = vpop.eup %2057  ;;  %v797_v31 = vadd.f32 1.0, %v2056_v21 }
 0x155   :  { %v2060_v32 = vpop.eup %2059  ;;  %v803_v41 = vadd.f32 1.0, %v2058_v25  ;;  %v811_v50 = vmul.f32 %v795_v24, %v683_v34  ;;  %v2022_v25 = vld [vmem:[#allocation5 + $0x180] sm:$0xff]  }
 0x156   :  { %v2062_v42 = vpop.eup %2061  ;;  %v805_v46 = vadd.f32 1.0, %v2060_v32  ;;  %v813_v28 = vmul.f32 %v797_v31, %v685_v45 }
 0x157   :  { %v2064_v47 = vpop.eup %2063  ;;  %v796_v49 = vadd.f32 1.0, %v2062_v42  ;;  %v819_v51 = vmul.f32 %v803_v41, %v691_v40 }
 0x158   :  { %v2066_v5 = vpop.eup %2065  ;;  %v804_v52 = vadd.f32 1.0, %v2064_v47  ;;  %v821_v53 = vmul.f32 %v805_v46, %v693_v44 }
 0x159   :  { %v2068_v54 = vpop.eup %2067  ;;  %v798_v56 = vadd.f32 1.0, %v2066_v5  ;;  %v827_v29 = vpack.c.bf16 %v819_v51, %v811_v50  ;;  %v812_v57 = vmul.f32 %v796_v49, %v684_v48  ;;  %v2027_v48 = vld [vmem:[#allocation5 + $0x150] sm:$0xff]   ;;  %v2026_v5 = vld [vmem:[#allocation5 + $0x188] sm:$0xff]  }
 0x15a   :  { %v820_v58 = vmul.f32 %v804_v52, %v692_v18  ;;  %v806_v59 = vadd.f32 1.0, %v2068_v54  ;;  %v829_v22 = vpack.c.bf16 %v821_v53, %v813_v28  ;;  %v2028_v54 = vld [vmem:[#allocation5 + $0x1d0] sm:$0xff]  }
 0x15b   :  { %v631_v60 = vpop.f32.mrb[4].mxu0  ;;  %v674_v61 = vpop.f32.mrb[4].mxu1  ;;  %v814_v9 = vmul.f32 %v798_v56, %v686_v62  ;;  %v2030_v62 = vld [vmem:[#allocation5 + $0x190] sm:$0xff]  }
 0x15c   :  { %v2371_v63 = vadd.f32 %v631_v60, %v170_v26  ;;  %v2373_v38 = vadd.f32 %v674_v61, %v178_v27  ;;  %v633_v1 = vpop.f32.mrb[5].mxu0  ;;  %v676_v2 = vpop.f32.mrb[5].mxu1  ;;  %v828_v0 = vpack.c.bf16 %v820_v58, %v812_v57  ;;  %v822_v8 = vmul.f32 %v806_v59, %v694_v19  ;;  %v2031_v60 = vld [vmem:[#allocation5 + $0x158] sm:$0xff]  }
 0x15d   :  { %v2375_v39 = vadd.f32 %v633_v1, %v174_v43  ;;  %v2377_v4 = vadd.f32 %v676_v2, %v182_v55  ;;  %v635_v6 = vpop.f32.mrb[6].mxu0  ;;  %v678_v7 = vpop.f32.mrb[6].mxu1 }
 0x15e   :  { %v703_v11 = vmul.f32 0.044715, %v2371_v63  ;;  %v705_v23 = vmul.f32 0.044715, %v2373_v38  ;;  %v2381_v12 = vadd.f32 %v635_v6, %v170_v26  ;;  %v2383_v14 = vadd.f32 %v678_v7, %v178_v27  ;;  %1386 = vmatprep.mubr.bf16.mxu0 %v828_v0  ;;  %v637_v15 = vpop.f32.mrb[7].mxu0  ;;  %v680_v16 = vpop.f32.mrb[7].mxu1 }
 0x15f   :  { %v704_v17 = vmul.f32 0.044715, %v2375_v39  ;;  %v706_v20 = vmul.f32 0.044715, %v2377_v4  ;;  %v830_v21 = vpack.c.bf16 %v822_v8, %v814_v9  ;;  %v2387_v24 = vadd.f32 %v637_v15, %v174_v43  ;;  %1387 = vmatmul.mubr.bf16.vlgmr.msra.gmra.mrb[8].mxu0 %v827_v29  ;;  %v2025_v43 = vld [vmem:[#allocation5 + $0x108] sm:$0xff]   ;;  %v2029_v29 = vld [vmem:[#allocation5 + $0x110] sm:$0xff]  }
 0x160   :  { %v719_v31 = vmul.f32 %v703_v11, %v2371_v63  ;;  %v721_v32 = vmul.f32 %v705_v23, %v2373_v38  ;;  %v711_v26 = vmul.f32 0.044715, %v2381_v12  ;;  %v713_v27 = vmul.f32 0.044715, %v2383_v14  ;;  %1886 = vmatpush3.bf16.msra.mxu0 %v2021_v3  ;;  %v2032_v3 = vld [vmem:[#allocation5 + $0x1d8] sm:$0xff]   ;;  %v2035_v11 = vld [vmem:[#allocation5 + $0x160] sm:$0xff]  }
 0x161   :  { %v720_v34 = vmul.f32 %v704_v17, %v2375_v39  ;;  %v722_v40 = vmul.f32 %v706_v20, %v2377_v4  ;;  %1427 = vmatprep.mubr.bf16.mxu1 %v830_v21  ;;  %v712_v41 = vmul.f32 0.044715, %v2387_v24  ;;  %v2396_v42 = vadd.f32 %v680_v16, %v182_v55  ;;  %1887 = vmatprep.subr.bf16.mxu0 %v2023_v10  ;;  %v2033_v6 = vld [vmem:[#allocation5 + $0x118] sm:$0xff]   ;;  %v2036_v17 = vld [vmem:[#allocation5 + $0x1e0] sm:$0xff]  }
 0x162   :  { %v735_v45 = vmul.f32 %v719_v31, %v2371_v63  ;;  %v737_v44 = vmul.f32 %v721_v32, %v2373_v38  ;;  %v727_v46 = vmul.f32 %v711_v26, %v2381_v12  ;;  %v729_v47 = vmul.f32 %v713_v27, %v2383_v14  ;;  %1428 = vmatmul.mubr.bf16.vlgmr.msra.gmra.mrb[8].mxu1 %v829_v22  ;;  %v2034_v15 = vld [vmem:[#allocation5 + $0x198] sm:$0xff]   ;;  %v2037_v21 = vld [vmem:[#allocation5 + $0x120] sm:$0xff]   ;;  %v2040_v32 = vld [vmem:[#allocation5 + $0x1e8] sm:$0xff]  }
 0x163   :  { %v736_v49 = vmul.f32 %v720_v34, %v2375_v39  ;;  %v728_v50 = vmul.f32 %v712_v41, %v2387_v24  ;;  %v714_v51 = vmul.f32 0.044715, %v2396_v42  ;;  %1908 = vmatpush3.bf16.msra.mxu1 %v2022_v25  ;;  %v738_v55 = vmul.f32 %v722_v40, %v2377_v4  ;;  %v2039_v25 = vld [vmem:[#allocation5 + $0x168] sm:$0xff]   ;;  %v2038_v31 = vld [vmem:[#allocation5 + $0x1a0] sm:$0xff]  }
 0x164   :  { %v751_v18 = vadd.f32 %v735_v45, %v2371_v63  ;;  %v753_v52 = vadd.f32 %v737_v44, %v2373_v38  ;;  %v743_v28 = vmul.f32 %v727_v46, %v2381_v12  ;;  %v745_v53 = vmul.f32 %v729_v47, %v2383_v14  ;;  %1909 = vmatprep.subr.bf16.mxu1 %v2024_v33  ;;  %v2041_v26 = vld [vmem:[#allocation5 + $0x128] sm:$0xff]   ;;  %v2043_v33 = vld [vmem:[#allocation5 + $0x170] sm:$0xff]  }
 0x165   :  { %v744_v19 = vmul.f32 %v728_v50, %v2387_v24  ;;  %v730_v56 = vmul.f32 %v714_v51, %v2396_v42  ;;  %1888 = vmatpush3.bf16.msra.mxu0 %v2025_v43  ;;  %v752_v1 = vadd.f32 %v736_v49, %v2375_v39  ;;  %v754_v10 = vadd.f32 %v738_v55, %v2377_v4  ;;  %v2042_v40 = vld [vmem:[#allocation5 + $0x1a8] sm:$0xff]   ;;  %v2044_v45 = vld [vmem:[#allocation5 + $0x1f0] sm:$0xff]  }
 0x166   :  { %v767_v57 = vmul.f32 0.7978846, %v751_v18  ;;  %v769_v58 = vmul.f32 0.7978846, %v753_v52  ;;  %v759_v59 = vadd.f32 %v743_v28, %v2381_v12  ;;  %v761_v22 = vadd.f32 %v745_v53, %v2383_v14  ;;  %1889 = vmatprep.subr.bf16.mxu0 %v2027_v48  ;;  %v2045_v47 = vld [vmem:[#allocation5 + $0x130] sm:$0xff]  }
 0x167   :  { %v746_v61 = vmul.f32 %v730_v56, %v2396_v42  ;;  %1910 = vmatpush3.bf16.msra.mxu1 %v2026_v5  ;;  %v760_v2 = vadd.f32 %v744_v19, %v2387_v24  ;;  %v768_v7 = vmul.f32 0.7978846, %v752_v1  ;;  %v770_v16 = vmul.f32 0.7978846, %v754_v10  ;;  %v2047_v5 = vld [vmem:[#allocation5 + $0x178] sm:$0xff]  }
 0x168   :  { %2069 = vtanh.f32 %v767_v57  ;;  %v775_v0 = vmul.f32 0.7978846, %v759_v59  ;;  %v777_v8 = vmul.f32 0.7978846, %v761_v22  ;;  %1911 = vmatprep.subr.bf16.mxu1 %v2028_v54  ;;  %v687_v48 = vmul.f32 0.5, %v2371_v63  ;;  %v2046_v54 = vld [vmem:[#allocation5 + $0x1b0] sm:$0xff]  }
 0x169   :  { %2071 = vtanh.f32 %v769_v58  ;;  %1890 = vmatpush3.bf16.msra.mxu0 %v2029_v29  ;;  %v776_v9 = vmul.f32 0.7978846, %v760_v2  ;;  %v762_v23 = vadd.f32 %v746_v61, %v2396_v42  ;;  %v695_v49 = vmul.f32 0.5, %v2381_v12  ;;  %v2048_v12 = vld [vmem:[#allocation5 + $0x1f8] sm:$0xff]  }
 0x16a   :  { %2073 = vtanh.f32 %v775_v0  ;;  %1891 = vmatprep.subr.bf16.mxu0 %v2031_v60  ;;  %v689_v18 = vmul.f32 0.5, %v2373_v38  ;;  %v697_v52 = vmul.f32 0.5, %v2383_v14  ;;  %v688_v55 = vmul.f32 0.5, %v2375_v39  ;;  %v2049_v14 = vld [vmem:[#allocation5 + $0x138] sm:$0xff]  }
 0x16b   :  { %2075 = vtanh.f32 %v777_v8  ;;  %1912 = vmatpush3.bf16.msra.mxu1 %v2030_v62  ;;  %v778_v20 = vmul.f32 0.7978846, %v762_v23  ;;  %v696_v57 = vmul.f32 0.5, %v2387_v24  ;;  %v690_v60 = vmul.f32 0.5, %v2377_v4 }
 0x16c   :  { %1913 = vmatprep.subr.bf16.mxu1 %v2032_v3  ;;  %2077 = vtanh.f32 %v768_v7  ;;  %v698_v61 = vmul.f32 0.5, %v2396_v42  ;;  %v2050_v3 = vld [vmem:[#allocation5 + $0x1b8] sm:$0xff]   ;;  %v2188_v4 = vmov 0.0|0.0   ;;  %v2190_v42 = vmov 0.0  }
 0x16d   :  { %1892 = vmatpush3.bf16.msra.mxu0 %v2033_v6  ;;  %2079 = vtanh.f32 %v776_v9 }
 0x16e   :  { %1893 = vmatprep.subr.bf16.mxu0 %v2035_v11  ;;  %2081 = vtanh.f32 %v770_v16  ;;  %v1768_v11 = vld [vmem:[%s2508_s4] ss:$0 sm:$0xff] }
 0x16f   :  { %1914 = vmatpush3.bf16.msra.mxu1 %v2034_v15  ;;  %2083 = vtanh.f32 %v778_v20 }
 0x170   :  { %1915 = vmatprep.subr.bf16.mxu1 %v2036_v17 }
 0x171   :  { %1894 = vmatpush3.bf16.msra.mxu0 %v2037_v21 }
 0x172   :  { %v2070_v27 = vpop.eup %2069  ;;  %1895 = vmatprep.subr.bf16.mxu0 %v2039_v25 }
 0x173   :  { %v2072_v34 = vpop.eup %2071  ;;  %1916 = vmatpush3.bf16.msra.mxu1 %v2038_v31  ;;  %v799_v41 = vadd.f32 1.0, %v2070_v27 }
 0x174   :  { %v2074_v43 = vpop.eup %2073  ;;  %1917 = vmatprep.subr.bf16.mxu1 %v2040_v32  ;;  %v801_v44 = vadd.f32 1.0, %v2072_v34 }
 0x175   :  { %v2076_v46 = vpop.eup %2075  ;;  %1896 = vmatpush3.bf16.msra.mxu0 %v2041_v26  ;;  %v807_v50 = vadd.f32 1.0, %v2074_v43  ;;  %v815_v56 = vmul.f32 %v799_v41, %v687_v48 }
 0x176   :  { %v2078_v51 = vpop.eup %2077  ;;  %1897 = vmatprep.subr.bf16.mxu0 %v2043_v33  ;;  %v809_v28 = vadd.f32 1.0, %v2076_v46  ;;  %v817_v59 = vmul.f32 %v801_v44, %v689_v18 }
 0x177   :  { %v2080_v53 = vpop.eup %2079  ;;  %1918 = vmatpush3.bf16.msra.mxu1 %v2042_v40  ;;  %v800_v19 = vadd.f32 1.0, %v2078_v51  ;;  %v823_v29 = vmul.f32 %v807_v50, %v695_v49 }
 0x178   :  { %v2082_v63 = vpop.eup %2081  ;;  %1919 = vmatprep.subr.bf16.mxu1 %v2044_v45  ;;  %v808_v58 = vadd.f32 1.0, %v2080_v53  ;;  %v825_v22 = vmul.f32 %v809_v28, %v697_v52 }
 0x179   :  { %v2084_v38 = vpop.eup %2083  ;;  %1898 = vmatpush3.bf16.msra.mxu0 %v2045_v47  ;;  %v802_v62 = vadd.f32 1.0, %v2082_v63  ;;  %v831_v39 = vpack.c.bf16 %v823_v29, %v815_v56  ;;  %v816_v1 = vmul.f32 %v800_v19, %v688_v55  ;;  %v1520_v29 = vmul.f32 %v2274_v35, %v2267_v13  ;;  %v1524_v13 = vld [vmem:[%s2509_s5 + $0x8] sm:$0xff] }
 0x17a   :  { %1899 = vmatprep.subr.bf16.mxu0 %v2047_v5  ;;  %v824_v2 = vmul.f32 %v808_v58, %v696_v57  ;;  %v810_v0 = vadd.f32 1.0, %v2084_v38  ;;  %v833_v8 = vpack.c.bf16 %v825_v22, %v817_v59  ;;  %v1523_v57 = vld [vmem:[%s2509_s5] sm:$0xff]  ;;  %v1525_v58 = vld [vmem:[%s2509_s5 + $0x10] sm:$0xff]  ;;  %v1526_v22 = vld [vmem:[%s2509_s5 + $0x18] sm:$0xff]  ;;  %v81_v38 = vmul.f32 %v2274_v35, %v2271_v30 }
 0x17b   :  { %1920 = vmatpush3.bf16.msra.mxu1 %v2046_v54  ;;  %v818_v6 = vmul.f32 %v802_v62, %v690_v60  ;;  %v1529_v59 = vld [vmem:[%s2509_s5 + $0x30] sm:$0xff] }
 0x17c   :  { %1921 = vmatprep.subr.bf16.mxu1 %v2048_v12  ;;  %v832_v24 = vpack.c.bf16 %v824_v2, %v816_v1  ;;  %v826_v7 = vmul.f32 %v810_v0, %v698_v61  ;;  %v1522_v12 = vsel %vm1521_vm1, 1.0, %v1520_v29 }
 0x17d   :  { %1900 = vmatpush3.bf16.msra.mxu0 %v2049_v14 }
 0x17e   :  { %1468 = vmatprep.mubr.bf16.mxu0 %v832_v24  ;;  %v834_v9 = vpack.c.bf16 %v826_v7, %v818_v6  ;;  %1966 = vmatprep.subr.bf16.mxu0 %v2188_v4 }
 0x17f   :  { %1922 = vmatpush3.bf16.msra.mxu1 %v2050_v3 }
 0x180   :  { %1509 = vmatprep.mubr.bf16.mxu1 %v834_v9  ;;  %1469 = vmatmul.mubr.bf16.vlgmr.msra.gmra.mrb[12].mxu0 %v831_v39 }
 0x181   :  { %1969 = vmatprep.subr.bf16.mxu1 %v2188_v4  ;;  %1945 = vmatprep.mubr.msk.f32.mxu0 %vm2189_vm0, %v2190_v42 }
 0x182   :  { %1510 = vmatmul.mubr.bf16.vlgmr.msra.gmra.mrb[12].mxu1 %v833_v8 }
 0x183   :  { %1957 = vmatprep.mubr.msk.f32.mxu1 %vm2189_vm0, %v2190_v42 }
 0x232   :  { %v1857_v10 = vpop.f32.mrb[8].mxu0 }
 0x233   :  { %v1858_v23 = vpop.f32.mrb[9].mxu0 }
 0x234   :  { %v1859_v15 = vadd.f32 %v1858_v23, %v1857_v10  ;;  %v1860_v16 = vpop.f32.mrb[10].mxu0 }
 0x235   :  { %v1879_v17 = vpop.f32.mrb[8].mxu1  ;;  %v1861_v20 = vpop.f32.mrb[11].mxu0 }
 0x236   :  { %v1389_v21 = vadd.f32 %v1859_v15, %v1768_v11  ;;  %v1880_v25 = vpop.f32.mrb[9].mxu1  ;;  %v1862_v31 = vadd.f32 %v1861_v20, %v1860_v16 }
 0x237   :  { %v1881_v32 = vadd.f32 %v1880_v25, %v1879_v17  ;;  %v1882_v26 = vpop.f32.mrb[10].mxu1 }
 0x238   :  { %v1392_v27 = vadd.f32 %v1862_v31, %v1768_v11  ;;  %v1883_v33 = vpop.f32.mrb[11].mxu1 }
 0x239   :  { %v1430_v34 = vadd.f32 %v1881_v32, %v1389_v21  ;;  %v1884_v40 = vadd.f32 %v1883_v33, %v1882_v26 }
 0x23b   :  { %v1433_v41 = vadd.f32 %v1884_v40, %v1392_v27 }
 0x253   :  { %v1901_v43 = vpop.f32.mrb[12].mxu0 }
 0x254   :  { %v1902_v45 = vpop.f32.mrb[13].mxu0 }
 0x255   :  { %v1923_v44 = vpop.f32.mrb[12].mxu1  ;;  %v1903_v46 = vadd.f32 %v1902_v45, %v1901_v43  ;;  %v1904_v47 = vpop.f32.mrb[14].mxu0 }
 0x256   :  { %v1924_v48 = vpop.f32.mrb[13].mxu1  ;;  %v1905_v49 = vpop.f32.mrb[15].mxu0 }
 0x257   :  { %v1471_v50 = vadd.f32 %v1903_v46, %v1430_v34  ;;  %v1925_v51 = vadd.f32 %v1924_v48, %v1923_v44  ;;  %v1926_v5 = vpop.f32.mrb[14].mxu1  ;;  %v1906_v18 = vadd.f32 %v1905_v49, %v1904_v47 }
 0x258   :  { %v1927_v52 = vpop.f32.mrb[15].mxu1 }
 0x259   :  { %v1512_v28 = vadd.f32 %v1925_v51, %v1471_v50  ;;  %v1474_v53 = vadd.f32 %v1906_v18, %v1433_v41  ;;  %v1928_v54 = vadd.f32 %v1927_v52, %v1926_v5 }
 0x25b   :  { %v1515_v55 = vadd.f32 %v1928_v54, %v1474_v53  ;;  %v1518_v19 = vadd.f32 %v1512_v28, %v2277_v36  ;;  %v1527_v36 = vld [vmem:[%s2509_s5 + $0x20] sm:$0xff] }
 0x25d   :  { %v1519_v56 = vadd.f32 %v1515_v55, %v2280_v37  ;;  %v1528_v37 = vld [vmem:[%s2509_s5 + $0x28] sm:$0xff]  ;;  %s2191_s5 = smov [#allocation7]  }
 0x25e   :  { %s1675_s23 = sshll.u32 %s2191_s5, 4  ;;  %s1676_s23 = int_to_ptr.vmem [resolvable:$true] %s1675_s23 }
 0x25f   :  { %v1967_v63 = vpack.c.bf16 %v1519_v56, %v1518_v19  ;;  %s2129_s25 = scalar_lea.vmem %s1676_s23, 384  ;;  %p2134_p3 = scmp.lt.s32.totalorder %s1676_s23, %s1676_s23 }
 0x260   :  { %p2130_p2 = scmp.ne.s32.totalorder %s1676_s23, %s2129_s25  ;;  %p2135_p4 = scmp.lt.s32.totalorder %s2129_s25, %s2129_s25 }
 0x261   :  { %1968 = vmatpush3.bf16.msra.mxu0 %v1967_v63  ;;  %1971 = vmatpush3.bf16.msra.mxu1 %v1967_v63 }
 0x262   :  { %1943 = vmatprep.subr.mxu0 %v2190_v42  ;;  %1970 = vmatprep.subr.mxu1 %v2190_v42  ;;  %p2136_p5 = por %p2135_p4, %p2134_p3 }
 0x264   :  { %p2137_p6 = pnand %p2136_p5, %p2130_p2 }
 0x265   :  { %1944 = vmatpush3.msk.msra.mxu0 %vm1552_vm2, %v1522_v12  ;;  %1972 = vmatpush3.msk.msra.mxu1 %vm1552_vm2, %v1522_v12 }
 0x266   :  { %1946 = vmatmul.mubr.msk.f32.vlgmr.msra.gmra.mrb[16].mxu0 %vm1530_vm3, %v1523_v57  ;;  %1958 = vmatmul.mubr.msk.f32.vlgmr.msra.gmra.mrb[16].mxu1 %vm1530_vm3, %v1527_v36 }
 0x267   :  { %1948 = vmatprep.mubr.msk.f32.mxu0 %vm2189_vm0, %v2190_v42  ;;  %1960 = vmatprep.mubr.msk.f32.mxu1 %vm2189_vm0, %v2190_v42 }
 0x26a   :  { %1949 = vmatmul.mubr.msk.f32.gmra.mrb[18].mxu0 %vm1530_vm3, %v1524_v13  ;;  %1961 = vmatmul.mubr.msk.f32.gmra.mrb[18].mxu1 %vm1530_vm3, %v1528_v37 }
 0x26b   :  { %1951 = vmatprep.mubr.msk.f32.mxu0 %vm2189_vm0, %v2190_v42  ;;  %1963 = vmatprep.mubr.msk.f32.mxu1 %vm2189_vm0, %v2190_v42 }
 0x26e   :  { %1952 = vmatmul.mubr.msk.f32.gmra.mrb[20].mxu0 %vm1530_vm3, %v1525_v58  ;;  %1964 = vmatmul.mubr.msk.f32.gmra.mrb[20].mxu1 %vm1530_vm3, %v1529_v59 }
 0x26f   :  { %1954 = vmatprep.mubr.msk.f32.mxu0 %vm2189_vm0, %v2190_v42 }
 0x272   :  { %1955 = vmatmul.mubr.msk.f32.gmra.mrb[22].mxu0 %vm1530_vm3, %v1526_v22 }
 0x339   :  { %v1622_v14 = vpop.f32.mrb[16].mxu0  ;;  %v1642_v60 = vpop.f32.mrb[16].mxu1 }
 0x33a   :  { %v1656_v61 = vmul.f32 %v1622_v14, %v81_v38  ;;  %v1947_v62 = vpop.f32.mrb[17].mxu0  ;;  %v1660_v39 = vmul.f32 %v1642_v60, %v81_v38  ;;  %v1959_v1 = vpop.f32.mrb[17].mxu1 }
 0x33c   :  { %1663 = vst [vmem:[#allocation7] sm:$0xff] %v1656_v61  ;;  %1667 = vst [vmem:[#allocation8 + $0x8] sm:$0xff] %v1660_v39 }
 0x33d   :  { %v1627_v2 = vpop.f32.mrb[18].mxu0  ;;  %v1647_v0 = vpop.f32.mrb[18].mxu1 }
 0x33e   :  { %v1657_v8 = vmul.f32 %v1627_v2, %v81_v38  ;;  %v1950_v3 = vpop.f32.mrb[19].mxu0  ;;  %v1661_v24 = vmul.f32 %v1647_v0, %v81_v38  ;;  %v1962_v6 = vpop.f32.mrb[19].mxu1 }
 0x340   :  { %1664 = vst [vmem:[#allocation7 + $0x8] sm:$0xff] %v1657_v8  ;;  %1668 = vst [vmem:[#allocation8 + $0x10] sm:$0xff] %v1661_v24 }
 0x341   :  { %v1632_v7 = vpop.f32.mrb[20].mxu0  ;;  %v1652_v30 = vpop.f32.mrb[20].mxu1 }
 0x342   :  { %v1658_v35 = vmul.f32 %v1632_v7, %v81_v38  ;;  %v1953_v9 = vpop.f32.mrb[21].mxu0  ;;  %v1662_v4 = vmul.f32 %v1652_v30, %v81_v38  ;;  %v1965_v42 = vpop.f32.mrb[21].mxu1 }
 0x344   :  { %1665 = vst [vmem:[#allocation7 + $0x10] sm:$0xff] %v1658_v35  ;;  %1669 = vst [vmem:[#allocation8 + $0x18] sm:$0xff] %v1662_v4 }
 0x345   :  { %v1637_v10 = vpop.f32.mrb[22].mxu0 }
 0x346   :  { %2140 = shalt.err (!%p2137_p6)
}
 0x347   :  { %s2141_s3 = scalar_lea.hbm %s2510_s6, 384 }
 0x348   :  { %p2142_p7 = scmp.ne.s32.totalorder %s2510_s6, %s2141_s3  ;;  %p2145_p8 = scmp.lt.u32.totalorder %s2141_s3, %s2510_s6 }
 0x34a   :  { %p2147_p9 = pnand %p2145_p8, %p2142_p7 }
 0x34c   :  { %2150 = shalt.err (!%p2147_p9)
}
 0x34d   :  { %s2193_s8 = smov 128   ;;  %s2194_s2 = smov 8   ;;  %v1659_v11 = vmul.f32 %v1637_v10, %v81_v38  ;;  %v1956_v23 = vpop.f32.mrb[23].mxu0 }
 0x34e   :  { %1681 = dma.vmem_to_hbm [thread:$0]  %s1676_s23, 384, %s2510_s6, [#allocation4], %s2193_s8, %s2193_s8, %s2194_s2  }
 0x34f   :  { %1666 = vst [vmem:[#allocation8] sm:$0xff] %v1659_v11  ;;  %s2151_s10 = scalar_lea.vmem %s1688_s1, 512  ;;  %p2156_p11 = scmp.lt.s32.totalorder %s1688_s1, %s1688_s1 }
 0x350   :  { %p2152_p10 = scmp.ne.s32.totalorder %s1688_s1, %s2151_s10  ;;  %p2157_p12 = scmp.lt.s32.totalorder %s2151_s10, %s2151_s10 }
 0x352   :  { %p2158_p13 = por %p2157_p12, %p2156_p11 }
 0x354   :  { %p2159_p0 = pnand %p2158_p13, %p2152_p10 }
 0x356   :  { %2162 = shalt.err (!%p2159_p0)
}
 0x357   :  { %s2163_s13 = scalar_lea.hbm %s2511_s7, 512 }
 0x358   :  { %p2164_p1 = scmp.ne.s32.totalorder %s2511_s7, %s2163_s13  ;;  %p2167_p2 = scmp.lt.u32.totalorder %s2163_s13, %s2511_s7 }
 0x35a   :  { %p2169_p3 = pnand %p2167_p2, %p2164_p1 }
 0x35c   :  { %2172 = shalt.err (!%p2169_p3)
}
 0x35d   :  { %1693 = dma.vmem_to_hbm [thread:$0]  %s1688_s1, 512, %s2511_s7, [#allocation9], %s2193_s8, %s2193_s8, %s2194_s2  }
 0x35e   :  { %2177 = dma.done.wait [#allocation4], 384  }
 0x35f   :  { %2178 = vsyncadd [#allocation4], 4294966912 }
 0x360   :  { %2179 = dma.done.wait [#allocation9], 512  }
 0x361   :  { %2180 = vsyncadd [#allocation9], 4294966784 }
 0x362   :  { %1700 = vsyncpa [#allocation3], 1 }
 0x363   :  { %1701 = vsyncpa [#allocation6], 1 }
 0x364   :  { %1702 = vsyncpa [#allocation4], 1 }
 0x365   :  { %1703 = vsyncpa [#allocation9], 1 }

</bundles_post_ra>
